<compile_context>
chip_gen: v5e
topology: v5e:2x2
jax: 0.10.0
libtpu: 0.0.40
codegen_flags: <defaults>
</compile_context>

<pallas_src>
import functools

import jax
import jax.numpy as jnp
from jax.experimental import pallas as pl
from jax.experimental.pallas import tpu as pltpu

HIDDEN = 256
GROUPS = 16
GROUP_SIZE = HIDDEN // GROUPS
EPS = 1e-5
DOUBLE_LAYER = True   # mirrors `args.double_layer` (static at trace time)
LANE = 128


def _round_up(n, m):
    return (n + m - 1) // m * m


def _group_norm(h, avg):
    """F.group_norm(h, 16) (no affine, eps=1e-5) for h of shape (M, 256).

    avg is the (256, 256) block-diagonal group-averaging matrix, so a single
    full-width MXU dot per statistic yields per-channel mean / E[x^2].
    """
    mean_full = jnp.dot(h, avg, preferred_element_type=jnp.float32)       # (M, 256)
    ex2_full = jnp.dot(h * h, avg, preferred_element_type=jnp.float32)    # (M, 256)
    # Clamp: f32 cancellation can make E[x^2]-mean^2 slightly negative.
    var_full = jnp.maximum(ex2_full - mean_full * mean_full, 0.0)
    return (h - mean_full) * jax.lax.rsqrt(var_full + EPS)


def actor_kernel(*refs, double_layer):
    if double_layer:
        (x_ref, avg_ref, w1_ref, b1_ref, w2_ref, b2_ref, w3_ref, b3_ref,
         wmu_ref, bmu_ref, scale_ref, bias_ref, o_ref) = refs
    else:
        (x_ref, avg_ref, w1_ref, b1_ref, w2_ref, b2_ref,
         wmu_ref, bmu_ref, scale_ref, bias_ref, o_ref) = refs
        w3_ref = b3_ref = None

    avg = avg_ref[...]                       # resident f32 group-averaging matrix
    mm_dtype = w1_ref.dtype                  # f32 default; bf16 if wrapper casts weights

    def layer(h, w_ref, b_ref):
        y = jnp.dot(h.astype(mm_dtype), w_ref[...],
                    preferred_element_type=jnp.float32) + b_ref[...]
        return jnp.maximum(_group_norm(y, avg), 0.0)

    h = layer(x_ref[...], w1_ref, b1_ref)          # fc1 -> GN -> relu
    h = layer(h, w2_ref, b2_ref)                   # fc2 -> GN -> relu
    if double_layer:
        h = layer(h, w3_ref, b3_ref)               # fc3 -> GN -> relu

    mu = jnp.tanh(jnp.dot(h.astype(mm_dtype), wmu_ref[...],
                          preferred_element_type=jnp.float32) + bmu_ref[...])
    o_ref[...] = mu * scale_ref[...] + bias_ref[...]


def actor_forward(x, params, *, double_layer=DOUBLE_LAYER, block_rows=512,
                  use_bf16=False):
    B, obs_dim = x.shape
    act_dim = params["wmu"].shape[1]

    # Batch block: multiple of 8 sublanes, at most `block_rows`.
    bm = min(block_rows, _round_up(B, 8))
    # Prefer >= 2 grid steps when the batch permits so the "parallel" axis can
    # shard across both TensorCores on v7x (no cost on 1-TC chips).
    if B >= 16 and _round_up(B, bm) // bm < 2:
        bm = _round_up((B + 1) // 2, 8)
    padded_b = _round_up(B, bm)
    if padded_b != B:
        x = jnp.pad(x, ((0, padded_b - B), (0, 0)))
    # NOTE: obs_dim is intentionally left unpadded (keeps the per-step DMA small).

    # Block-diagonal group-averaging matrix, built once (VMEM-resident).
    gidx = jnp.arange(HIDDEN, dtype=jnp.int32) // GROUP_SIZE
    avg = (gidx[:, None] == gidx[None, :]).astype(jnp.float32) / GROUP_SIZE   # (256,256)

    # Lane-dense output slab: pad the action dimension up to 128 lanes.
    act_pad = _round_up(act_dim, LANE)
    pad_cols = ((0, 0), (0, act_pad - act_dim))
    wmu = jnp.pad(params["wmu"], pad_cols)
    bmu = jnp.pad(params["bmu"], pad_cols)
    scale = jnp.pad(params["action_scale"], pad_cols)
    bias = jnp.pad(params["action_bias"], pad_cols)

    w_dtype = jnp.bfloat16 if use_bf16 else jnp.float32
    w1 = params["w1"].astype(w_dtype)
    w2 = params["w2"].astype(w_dtype)
    w3 = params["w3"].astype(w_dtype)
    wmu = wmu.astype(w_dtype)

    def resident(arr):   # full-array block, same block index every grid step
        return pl.BlockSpec(arr.shape, lambda i: (0, 0))

    inputs = [x, avg, w1, params["b1"], w2, params["b2"]]
    in_specs = [pl.BlockSpec((bm, obs_dim), lambda i: (i, 0)),
                resident(avg),
                resident(w1), resident(params["b1"]),
                resident(w2), resident(params["b2"])]
    if double_layer:
        inputs += [w3, params["b3"]]
        in_specs += [resident(w3), resident(params["b3"])]
    inputs += [wmu, bmu, scale, bias]
    in_specs += [resident(wmu), resident(bmu), resident(scale), resident(bias)]

    out = pl.pallas_call(
        functools.partial(actor_kernel, double_layer=double_layer),
        out_shape=jax.ShapeDtypeStruct((padded_b, act_pad), jnp.float32),
        grid_spec=pltpu.PrefetchScalarGridSpec(
            num_scalar_prefetch=0,
            grid=(padded_b // bm,),
            in_specs=in_specs,
            out_specs=pl.BlockSpec((bm, act_pad), lambda i: (i, 0)),
        ),
        compiler_params=pltpu.CompilerParams(
            dimension_semantics=("parallel",)),
    )(*inputs)
    return out[:B, :act_dim]


def init_params(key, obs_dim, act_dim):
    """Deterministic PyTorch-Linear-style init (uniform(-1/sqrt(fan_in), ...))."""
    def linear(k, fan_in, fan_out):
        kw, kb = jax.random.split(k)
        bound = 1.0 / jnp.sqrt(jnp.float32(fan_in))
        w = jax.random.uniform(kw, (fan_in, fan_out), jnp.float32, -bound, bound)
        b = jax.random.uniform(kb, (1, fan_out), jnp.float32, -bound, bound)
        return w, b

    k1, k2, k3, k4 = jax.random.split(key, 4)
    w1, b1 = linear(k1, obs_dim, HIDDEN)
    w2, b2 = linear(k2, HIDDEN, HIDDEN)
    w3, b3 = linear(k3, HIDDEN, HIDDEN)
    wmu, bmu = linear(k4, HIDDEN, act_dim)

    # synthetic action space: low = -2, high = 2 -> scale = 2, bias = 0
    action_low = jnp.full((1, act_dim), -2.0, jnp.float32)
    action_high = jnp.full((1, act_dim), 2.0, jnp.float32)
    return {
        "w1": w1, "b1": b1,
        "w2": w2, "b2": b2,
        "w3": w3, "b3": b3,
        "wmu": wmu, "bmu": bmu,
        "action_scale": (action_high - action_low) / 2.0,
        "action_bias": (action_high + action_low) / 2.0,
    }


def actor_reference(x, params, *, double_layer=DOUBLE_LAYER):
    """Pure-JAX reference of the PyTorch forward, for sanity checking."""
    def gn(h):
        hg = h.reshape(h.shape[0], GROUPS, GROUP_SIZE)
        m = hg.mean(axis=-1, keepdims=True)
        v = ((hg - m) ** 2).mean(axis=-1, keepdims=True)
        return ((hg - m) / jnp.sqrt(v + EPS)).reshape(h.shape)

    h = jax.nn.relu(gn(x @ params["w1"] + params["b1"]))
    h = jax.nn.relu(gn(h @ params["w2"] + params["b2"]))
    if double_layer:
        h = jax.nn.relu(gn(h @ params["w3"] + params["b3"]))
    mu = jnp.tanh(h @ params["wmu"] + params["bmu"])
    return mu * params["action_scale"] + params["action_bias"]


if __name__ == "__main__":
    key = jax.random.PRNGKey(0)
    k_param, k_x1, k_x2 = jax.random.split(key, 3)

    OBS_DIM, ACT_DIM = 17, 6   # HalfCheetah-ish
    params = init_params(k_param, OBS_DIM, ACT_DIM)

    # Small-batch check (single grid step), f32 path, tight tolerance.
    x_small = jax.random.normal(k_x1, (8, OBS_DIM), jnp.float32)
    out = jax.block_until_ready(actor_forward(x_small, params))
    ref = actor_reference(x_small, params)
    assert out.shape == (8, ACT_DIM)
    assert jnp.allclose(out, ref, atol=1e-4, rtol=1e-4), (
        f"double_layer=True max abs diff {jnp.max(jnp.abs(out - ref))}")

    # double_layer=False path (w3/b3 are not passed / not DMA'd).
    out_sl = jax.block_until_ready(actor_forward(x_small, params, double_layer=False))
    ref_sl = actor_reference(x_small, params, double_layer=False)
    assert jnp.allclose(out_sl, ref_sl, atol=1e-4, rtol=1e-4), (
        f"double_layer=False max abs diff {jnp.max(jnp.abs(out_sl - ref_sl))}")

    # Batched check: multi-block parallel grid + batch padding (260 -> 2 blocks).
    x_big = jax.random.normal(k_x2, (260, OBS_DIM), jnp.float32)
    out_big = jax.block_until_ready(actor_forward(x_big, params))
    ref_big = actor_reference(x_big, params)
    assert out_big.shape == (260, ACT_DIM)
    assert jnp.allclose(out_big, ref_big, atol=1e-4, rtol=1e-4), (
        f"batched max abs diff {jnp.max(jnp.abs(out_big - ref_big))}")

    # bf16 fast path for the fc matmuls (GroupNorm stats stay f32); relaxed tol.
    out_bf = jax.block_until_ready(actor_forward(x_big, params, use_bf16=True))
    assert jnp.allclose(out_bf, ref_big, atol=1e-1, rtol=1e-1), (
        f"bf16 max abs diff {jnp.max(jnp.abs(out_bf - ref_big))}")

    print("KERNEL_OK")
</pallas_src>

<mosaic_0001>
module attributes {stable_mosaic.version = 11 : i64} {
  func.func @actor_kernel(%arg0: i32, %arg1: memref<8x17xf32, #tpu.memory_space<vmem>>, %arg2: memref<256x256xf32, #tpu.memory_space<vmem>>, %arg3: memref<17x256xf32, #tpu.memory_space<vmem>>, %arg4: memref<1x256xf32, #tpu.memory_space<vmem>>, %arg5: memref<256x256xf32, #tpu.memory_space<vmem>>, %arg6: memref<1x256xf32, #tpu.memory_space<vmem>>, %arg7: memref<256x256xf32, #tpu.memory_space<vmem>>, %arg8: memref<1x256xf32, #tpu.memory_space<vmem>>, %arg9: memref<256x128xf32, #tpu.memory_space<vmem>>, %arg10: memref<1x128xf32, #tpu.memory_space<vmem>>, %arg11: memref<1x128xf32, #tpu.memory_space<vmem>>, %arg12: memref<1x128xf32, #tpu.memory_space<vmem>>, %arg13: memref<8x128xf32, #tpu.memory_space<vmem>>) attributes {dimension_semantics = [#tpu.dimension_semantics<parallel>], iteration_bounds = array<i64: 1>, scalar_prefetch = 0 : i64, scratch_operands = 0 : i64, tpu.core_type = #tpu.core_type<tc>, window_params = [{transform_indices = @transform_0, window_bounds = array<i64: 8, 17>}, {pipeline_mode = #tpu.pipeline_mode<synchronous>, transform_indices = @transform_1, window_bounds = array<i64: 256, 256>}, {pipeline_mode = #tpu.pipeline_mode<synchronous>, transform_indices = @transform_2, window_bounds = array<i64: 17, 256>}, {pipeline_mode = #tpu.pipeline_mode<synchronous>, transform_indices = @transform_3, window_bounds = array<i64: 1, 256>}, {pipeline_mode = #tpu.pipeline_mode<synchronous>, transform_indices = @transform_4, window_bounds = array<i64: 256, 256>}, {pipeline_mode = #tpu.pipeline_mode<synchronous>, transform_indices = @transform_5, window_bounds = array<i64: 1, 256>}, {pipeline_mode = #tpu.pipeline_mode<synchronous>, transform_indices = @transform_6, window_bounds = array<i64: 256, 256>}, {pipeline_mode = #tpu.pipeline_mode<synchronous>, transform_indices = @transform_7, window_bounds = array<i64: 1, 256>}, {pipeline_mode = #tpu.pipeline_mode<synchronous>, transform_indices = @transform_8, window_bounds = array<i64: 256, 128>}, {pipeline_mode = #tpu.pipeline_mode<synchronous>, transform_indices = @transform_9, window_bounds = array<i64: 1, 128>}, {pipeline_mode = #tpu.pipeline_mode<synchronous>, transform_indices = @transform_10, window_bounds = array<i64: 1, 128>}, {pipeline_mode = #tpu.pipeline_mode<synchronous>, transform_indices = @transform_11, window_bounds = array<i64: 1, 128>}, {transform_indices = @transform_12, window_bounds = array<i64: 8, 128>}]} {
    %c0 = arith.constant 0 : index
    %c0_0 = arith.constant 0 : index
    %0 = vector.load %arg2[%c0, %c0_0] : memref<256x256xf32, #tpu.memory_space<vmem>>, vector<256x256xf32>
    %c0_1 = arith.constant 0 : index
    %c0_2 = arith.constant 0 : index
    %1 = vector.load %arg1[%c0_1, %c0_2] : memref<8x17xf32, #tpu.memory_space<vmem>>, vector<8x17xf32>
    %c0_3 = arith.constant 0 : index
    %c0_4 = arith.constant 0 : index
    %2 = vector.load %arg3[%c0_3, %c0_4] : memref<17x256xf32, #tpu.memory_space<vmem>>, vector<17x256xf32>
    %cst = arith.constant dense<0.000000e+00> : vector<8x256xf32>
    %3 = tpu.matmul %1, %2, %cst {dimension_numbers = #tpu.dot_dimension_numbers<[1], [0], [0], [1], [0, 0, 1, 1], [], []>} : vector<8x17xf32>, vector<17x256xf32>, vector<8x256xf32> -> vector<8x256xf32>
    %c0_5 = arith.constant 0 : index
    %c0_6 = arith.constant 0 : index
    %4 = vector.load %arg4[%c0_5, %c0_6] : memref<1x256xf32, #tpu.memory_space<vmem>>, vector<1x256xf32>
    %5 = vector.broadcast %4 : vector<1x256xf32> to vector<8x256xf32>
    %6 = arith.addf %3, %5 : vector<8x256xf32>
    %cst_7 = arith.constant dense<0.000000e+00> : vector<8x256xf32>
    %7 = tpu.matmul %6, %0, %cst_7 {dimension_numbers = #tpu.dot_dimension_numbers<[1], [0], [0], [1], [0, 0, 1, 1], [], []>} : vector<8x256xf32>, vector<256x256xf32>, vector<8x256xf32> -> vector<8x256xf32>
    %8 = arith.mulf %6, %6 : vector<8x256xf32>
    %cst_8 = arith.constant dense<0.000000e+00> : vector<8x256xf32>
    %9 = tpu.matmul %8, %0, %cst_8 {dimension_numbers = #tpu.dot_dimension_numbers<[1], [0], [0], [1], [0, 0, 1, 1], [], []>} : vector<8x256xf32>, vector<256x256xf32>, vector<8x256xf32> -> vector<8x256xf32>
    %10 = arith.mulf %7, %7 : vector<8x256xf32>
    %11 = arith.subf %9, %10 : vector<8x256xf32>
    %cst_9 = arith.constant 0.000000e+00 : f32
    %12 = vector.broadcast %cst_9 : f32 to vector<8x256xf32>
    %13 = arith.maximumf %11, %12 : vector<8x256xf32>
    %14 = arith.subf %6, %7 : vector<8x256xf32>
    %cst_10 = arith.constant 9.99999974E-6 : f32
    %15 = vector.broadcast %cst_10 : f32 to vector<8x256xf32>
    %16 = arith.addf %13, %15 : vector<8x256xf32>
    %17 = math.rsqrt %16 : vector<8x256xf32>
    %18 = arith.mulf %14, %17 : vector<8x256xf32>
    %cst_11 = arith.constant 0.000000e+00 : f32
    %19 = vector.broadcast %cst_11 : f32 to vector<8x256xf32>
    %20 = arith.maximumf %18, %19 : vector<8x256xf32>
    %c0_12 = arith.constant 0 : index
    %c0_13 = arith.constant 0 : index
    %21 = vector.load %arg5[%c0_12, %c0_13] : memref<256x256xf32, #tpu.memory_space<vmem>>, vector<256x256xf32>
    %cst_14 = arith.constant dense<0.000000e+00> : vector<8x256xf32>
    %22 = tpu.matmul %20, %21, %cst_14 {dimension_numbers = #tpu.dot_dimension_numbers<[1], [0], [0], [1], [0, 0, 1, 1], [], []>} : vector<8x256xf32>, vector<256x256xf32>, vector<8x256xf32> -> vector<8x256xf32>
    %c0_15 = arith.constant 0 : index
    %c0_16 = arith.constant 0 : index
    %23 = vector.load %arg6[%c0_15, %c0_16] : memref<1x256xf32, #tpu.memory_space<vmem>>, vector<1x256xf32>
    %24 = vector.broadcast %23 : vector<1x256xf32> to vector<8x256xf32>
    %25 = arith.addf %22, %24 : vector<8x256xf32>
    %cst_17 = arith.constant dense<0.000000e+00> : vector<8x256xf32>
    %26 = tpu.matmul %25, %0, %cst_17 {dimension_numbers = #tpu.dot_dimension_numbers<[1], [0], [0], [1], [0, 0, 1, 1], [], []>} : vector<8x256xf32>, vector<256x256xf32>, vector<8x256xf32> -> vector<8x256xf32>
    %27 = arith.mulf %25, %25 : vector<8x256xf32>
    %cst_18 = arith.constant dense<0.000000e+00> : vector<8x256xf32>
    %28 = tpu.matmul %27, %0, %cst_18 {dimension_numbers = #tpu.dot_dimension_numbers<[1], [0], [0], [1], [0, 0, 1, 1], [], []>} : vector<8x256xf32>, vector<256x256xf32>, vector<8x256xf32> -> vector<8x256xf32>
    %29 = arith.mulf %26, %26 : vector<8x256xf32>
    %30 = arith.subf %28, %29 : vector<8x256xf32>
    %cst_19 = arith.constant 0.000000e+00 : f32
    %31 = vector.broadcast %cst_19 : f32 to vector<8x256xf32>
    %32 = arith.maximumf %30, %31 : vector<8x256xf32>
    %33 = arith.subf %25, %26 : vector<8x256xf32>
    %cst_20 = arith.constant 9.99999974E-6 : f32
    %34 = vector.broadcast %cst_20 : f32 to vector<8x256xf32>
    %35 = arith.addf %32, %34 : vector<8x256xf32>
    %36 = math.rsqrt %35 : vector<8x256xf32>
    %37 = arith.mulf %33, %36 : vector<8x256xf32>
    %cst_21 = arith.constant 0.000000e+00 : f32
    %38 = vector.broadcast %cst_21 : f32 to vector<8x256xf32>
    %39 = arith.maximumf %37, %38 : vector<8x256xf32>
    %c0_22 = arith.constant 0 : index
    %c0_23 = arith.constant 0 : index
    %40 = vector.load %arg7[%c0_22, %c0_23] : memref<256x256xf32, #tpu.memory_space<vmem>>, vector<256x256xf32>
    %cst_24 = arith.constant dense<0.000000e+00> : vector<8x256xf32>
    %41 = tpu.matmul %39, %40, %cst_24 {dimension_numbers = #tpu.dot_dimension_numbers<[1], [0], [0], [1], [0, 0, 1, 1], [], []>} : vector<8x256xf32>, vector<256x256xf32>, vector<8x256xf32> -> vector<8x256xf32>
    %c0_25 = arith.constant 0 : index
    %c0_26 = arith.constant 0 : index
    %42 = vector.load %arg8[%c0_25, %c0_26] : memref<1x256xf32, #tpu.memory_space<vmem>>, vector<1x256xf32>
    %43 = vector.broadcast %42 : vector<1x256xf32> to vector<8x256xf32>
    %44 = arith.addf %41, %43 : vector<8x256xf32>
    %cst_27 = arith.constant dense<0.000000e+00> : vector<8x256xf32>
    %45 = tpu.matmul %44, %0, %cst_27 {dimension_numbers = #tpu.dot_dimension_numbers<[1], [0], [0], [1], [0, 0, 1, 1], [], []>} : vector<8x256xf32>, vector<256x256xf32>, vector<8x256xf32> -> vector<8x256xf32>
    %46 = arith.mulf %44, %44 : vector<8x256xf32>
    %cst_28 = arith.constant dense<0.000000e+00> : vector<8x256xf32>
    %47 = tpu.matmul %46, %0, %cst_28 {dimension_numbers = #tpu.dot_dimension_numbers<[1], [0], [0], [1], [0, 0, 1, 1], [], []>} : vector<8x256xf32>, vector<256x256xf32>, vector<8x256xf32> -> vector<8x256xf32>
    %48 = arith.mulf %45, %45 : vector<8x256xf32>
    %49 = arith.subf %47, %48 : vector<8x256xf32>
    %cst_29 = arith.constant 0.000000e+00 : f32
    %50 = vector.broadcast %cst_29 : f32 to vector<8x256xf32>
    %51 = arith.maximumf %49, %50 : vector<8x256xf32>
    %52 = arith.subf %44, %45 : vector<8x256xf32>
    %cst_30 = arith.constant 9.99999974E-6 : f32
    %53 = vector.broadcast %cst_30 : f32 to vector<8x256xf32>
    %54 = arith.addf %51, %53 : vector<8x256xf32>
    %55 = math.rsqrt %54 : vector<8x256xf32>
    %56 = arith.mulf %52, %55 : vector<8x256xf32>
    %cst_31 = arith.constant 0.000000e+00 : f32
    %57 = vector.broadcast %cst_31 : f32 to vector<8x256xf32>
    %58 = arith.maximumf %56, %57 : vector<8x256xf32>
    %c0_32 = arith.constant 0 : index
    %c0_33 = arith.constant 0 : index
    %59 = vector.load %arg9[%c0_32, %c0_33] : memref<256x128xf32, #tpu.memory_space<vmem>>, vector<256x128xf32>
    %cst_34 = arith.constant dense<0.000000e+00> : vector<8x128xf32>
    %60 = tpu.matmul %58, %59, %cst_34 {dimension_numbers = #tpu.dot_dimension_numbers<[1], [0], [0], [1], [0, 0, 1, 1], [], []>} : vector<8x256xf32>, vector<256x128xf32>, vector<8x128xf32> -> vector<8x128xf32>
    %c0_35 = arith.constant 0 : index
    %c0_36 = arith.constant 0 : index
    %61 = vector.load %arg10[%c0_35, %c0_36] : memref<1x128xf32, #tpu.memory_space<vmem>>, vector<1x128xf32>
    %62 = vector.broadcast %61 : vector<1x128xf32> to vector<8x128xf32>
    %63 = arith.addf %60, %62 : vector<8x128xf32>
    %64 = math.tanh %63 : vector<8x128xf32>
    %c0_37 = arith.constant 0 : index
    %c0_38 = arith.constant 0 : index
    %65 = vector.load %arg11[%c0_37, %c0_38] : memref<1x128xf32, #tpu.memory_space<vmem>>, vector<1x128xf32>
    %66 = vector.broadcast %65 : vector<1x128xf32> to vector<8x128xf32>
    %67 = arith.mulf %64, %66 : vector<8x128xf32>
    %c0_39 = arith.constant 0 : index
    %c0_40 = arith.constant 0 : index
    %68 = vector.load %arg12[%c0_39, %c0_40] : memref<1x128xf32, #tpu.memory_space<vmem>>, vector<1x128xf32>
    %69 = vector.broadcast %68 : vector<1x128xf32> to vector<8x128xf32>
    %70 = arith.addf %67, %69 : vector<8x128xf32>
    %c0_41 = arith.constant 0 : index
    %c0_42 = arith.constant 0 : index
    %71 = vector.load %arg13[%c0_41, %c0_42] : memref<8x128xf32, #tpu.memory_space<vmem>>, vector<8x128xf32>
    tpu.vector_store %arg13[%c0_41, %c0_42], %70 {strides = array<i32>} : memref<8x128xf32, #tpu.memory_space<vmem>>, vector<8x128xf32>,
    return
  }
  func.func @transform_0(%arg0: i32) -> (i32, i32) {
    %c0_i32 = arith.constant 0 : i32
    %c0_i32_0 = arith.constant 0 : i32
    return %arg0, %c0_i32 : i32, i32
  }
  func.func @transform_1(%arg0: i32) -> (i32, i32) {
    %c0_i32 = arith.constant 0 : i32
    %c0_i32_0 = arith.constant 0 : i32
    %c0_i32_1 = arith.constant 0 : i32
    return %c0_i32, %c0_i32_0 : i32, i32
  }
  func.func @transform_2(%arg0: i32) -> (i32, i32) {
    %c0_i32 = arith.constant 0 : i32
    %c0_i32_0 = arith.constant 0 : i32
    %c0_i32_1 = arith.constant 0 : i32
    return %c0_i32, %c0_i32_0 : i32, i32
  }
  func.func @transform_3(%arg0: i32) -> (i32, i32) {
    %c0_i32 = arith.constant 0 : i32
    %c0_i32_0 = arith.constant 0 : i32
    %c0_i32_1 = arith.constant 0 : i32
    return %c0_i32, %c0_i32_0 : i32, i32
  }
  func.func @transform_4(%arg0: i32) -> (i32, i32) {
    %c0_i32 = arith.constant 0 : i32
    %c0_i32_0 = arith.constant 0 : i32
    %c0_i32_1 = arith.constant 0 : i32
    return %c0_i32, %c0_i32_0 : i32, i32
  }
  func.func @transform_5(%arg0: i32) -> (i32, i32) {
    %c0_i32 = arith.constant 0 : i32
    %c0_i32_0 = arith.constant 0 : i32
    %c0_i32_1 = arith.constant 0 : i32
    return %c0_i32, %c0_i32_0 : i32, i32
  }
  func.func @transform_6(%arg0: i32) -> (i32, i32) {
    %c0_i32 = arith.constant 0 : i32
    %c0_i32_0 = arith.constant 0 : i32
    %c0_i32_1 = arith.constant 0 : i32
    return %c0_i32, %c0_i32_0 : i32, i32
  }
  func.func @transform_7(%arg0: i32) -> (i32, i32) {
    %c0_i32 = arith.constant 0 : i32
    %c0_i32_0 = arith.constant 0 : i32
    %c0_i32_1 = arith.constant 0 : i32
    return %c0_i32, %c0_i32_0 : i32, i32
  }
  func.func @transform_8(%arg0: i32) -> (i32, i32) {
    %c0_i32 = arith.constant 0 : i32
    %c0_i32_0 = arith.constant 0 : i32
    %c0_i32_1 = arith.constant 0 : i32
    return %c0_i32, %c0_i32_0 : i32, i32
  }
  func.func @transform_9(%arg0: i32) -> (i32, i32) {
    %c0_i32 = arith.constant 0 : i32
    %c0_i32_0 = arith.constant 0 : i32
    %c0_i32_1 = arith.constant 0 : i32
    return %c0_i32, %c0_i32_0 : i32, i32
  }
  func.func @transform_10(%arg0: i32) -> (i32, i32) {
    %c0_i32 = arith.constant 0 : i32
    %c0_i32_0 = arith.constant 0 : i32
    %c0_i32_1 = arith.constant 0 : i32
    return %c0_i32, %c0_i32_0 : i32, i32
  }
  func.func @transform_11(%arg0: i32) -> (i32, i32) {
    %c0_i32 = arith.constant 0 : i32
    %c0_i32_0 = arith.constant 0 : i32
    %c0_i32_1 = arith.constant 0 : i32
    return %c0_i32, %c0_i32_0 : i32, i32
  }
  func.func @transform_12(%arg0: i32) -> (i32, i32) {
    %c0_i32 = arith.constant 0 : i32
    %c0_i32_0 = arith.constant 0 : i32
    return %arg0, %c0_i32 : i32, i32
  }
}

</mosaic_0001>

<bundles_post_ra>
// kernel: tpu_custom_call.1
= control target key start
LH: loop header
LB: loop body
LE: loop exit
PB: predicated region body
PF: predicated region fallthrough
CT: control target
= control target key end

     0   :  { %17 = vsyncpa [#allocation3], 0  ;;  %s2377_s0 = inlined_call_operand.hbm [shape: f32[8,17], index: 0, kind: input, shape index: {}]   ;;  %s2378_s1 = inlined_call_operand.hbm [shape: f32[256,256], index: 1, kind: input, shape index: {}]   ;;  %s2379_s2 = inlined_call_operand.hbm [shape: f32[17,256], index: 2, kind: input, shape index: {}]   ;;  %s2380_s3 = inlined_call_operand.vmem [shape: f32[1,256], index: 3, kind: input, shape index: {}]   ;;  %s2381_s4 = inlined_call_operand.hbm [shape: f32[256,256], index: 4, kind: input, shape index: {}]   ;;  %s2382_s5 = inlined_call_operand.vmem [shape: f32[1,256], index: 5, kind: input, shape index: {}]   ;;  %s2383_s6 = inlined_call_operand.hbm [shape: f32[256,256], index: 6, kind: input, shape index: {}]   ;;  %s2384_s7 = inlined_call_operand.vmem [shape: f32[1,256], index: 7, kind: input, shape index: {}]   ;;  %s2385_s8 = inlined_call_operand.hbm [shape: f32[256,128], index: 8, kind: input, shape index: {}]   ;;  %s2386_s9 = inlined_call_operand.vmem [shape: f32[1,128], index: 9, kind: input, shape index: {}]   ;;  %s2387_s10 = inlined_call_operand.vmem [shape: f32[1,128], index: 10, kind: input, shape index: {}]   ;;  %s2388_s11 = inlined_call_operand.vmem [shape: f32[1,128], index: 11, kind: input, shape index: {}]   ;;  %s2389_s12 = inlined_call_operand.hbm [shape: f32[8,128], index: 12, kind: output, shape index: {}]  }
   0x1   :  { %18 = vsyncpa [#allocation6], 0 }
   0x2   :  { %19 = vsyncpa [#allocation9], 0 }
   0x3   :  { %20 = vsyncpa [#allocation12], 0  ;;  %s37_s23 = sshll.u32 %s2378_s1, 4  ;;  %s38_s23 = int_to_ptr.hbm [resolvable:$true] %s37_s23 }
   0x4   :  { %21 = vsyncpa [#allocation4], 0  ;;  %s1532_s24 = smov [#allocation5]   ;;  %s65_s28 = sshll.u32 %s2381_s4, 4  ;;  %s66_s28 = int_to_ptr.hbm [resolvable:$true] %s65_s28 }
   0x5   :  { %s39_s25 = sshll.u32 %s1532_s24, 4  ;;  %s1533_s29 = smov 256   ;;  %s40_s25 = int_to_ptr.vmem [resolvable:$true] %s39_s25 }
   0x6   :  { %s1534_s30 = smov 16   ;;  %s1535_s13 = smov [#allocation8]  }
   0x7   :  { %45 = dma.hbm_to_vmem [thread:$0]  %s38_s23, 8192, %s40_s25, [#allocation6], %s1533_s29, %s1533_s29, %s1534_s30  }
   0x8   :  { %s67_s14 = sshll.u32 %s1535_s13, 4  ;;  %s27_s16 = sshll.u32 %s2377_s0, 4  ;;  %s68_s14 = int_to_ptr.vmem [resolvable:$true] %s67_s14  ;;  %s28_s16 = int_to_ptr.hbm [resolvable:$true] %s27_s16 }
   0x9   :  { %73 = dma.hbm_to_vmem [thread:$0]  %s66_s28, 8192, %s68_s14, [#allocation9], %s1533_s29, %s1533_s29, %s1534_s30  }
   0xa   :  { %s50_s18 = sshll.u32 %s2379_s2, 4  ;;  %s1536_s19 = smov [#allocation2]   ;;  %s51_s18 = int_to_ptr.hbm [resolvable:$true] %s50_s18 }
   0xb   :  { %s29_s20 = sshll.u32 %s1536_s19, 4  ;;  %s1537_s21 = smov [#allocation7]   ;;  %s30_s20 = int_to_ptr.vmem [resolvable:$true] %s29_s20 }
   0xc   :  { %32 = dma.hbm_to_vmem [thread:$0]  %s28_s16, 128, %s30_s20, [#allocation3]  }
   0xd   :  { %s52_s22 = sshll.u32 %s1537_s21, 4  ;;  %s80_s0 = sshll.u32 %s2383_s6, 4  ;;  %s53_s22 = int_to_ptr.vmem [resolvable:$true] %s52_s22  ;;  %s81_s0 = int_to_ptr.hbm [resolvable:$true] %s80_s0 }
   0xe   :  { %58 = dma.hbm_to_vmem [thread:$0]  %s51_s18, 768, %s53_s22, [#allocation6], %s1533_s29, %s1533_s29, %s1534_s30  }
   0xf   :  { %s95_s2 = sshll.u32 %s2385_s8, 4  ;;  %s1538_s27 = smov [#allocation10]   ;;  %s96_s2 = int_to_ptr.hbm [resolvable:$true] %s95_s2 }
  0x10   :  { %s82_s28 = sshll.u32 %s1538_s27, 4  ;;  %s1539_s13 = smov [#allocation11]   ;;  %s83_s28 = int_to_ptr.vmem [resolvable:$true] %s82_s28 }
  0x11   :  { %88 = dma.hbm_to_vmem [thread:$0]  %s81_s0, 8192, %s83_s28, [#allocation9], %s1533_s29, %s1533_s29, %s1534_s30  }
  0x12   :  { %s97_s6 = sshll.u32 %s1539_s13, 4  ;;  %s1540_s14 = smov 128   ;;  %s98_s6 = int_to_ptr.vmem [resolvable:$true] %s97_s6 }
  0x13   :  { %s1541_s15 = smov 8  }
  0x14   :  { %103 = dma.hbm_to_vmem [thread:$0]  %s96_s2, 4096, %s98_s6, [#allocation12], %s1540_s14, %s1540_s14, %s1541_s15  }
  0x15   :  { %1522 = dma.done.wait [#allocation3], 128  }
  0x16   :  { %1523 = vsyncadd [#allocation3], 4294967168 }
  0x17   :  { %1524 = dma.done.wait [#allocation6], 8960  }
  0x18   :  { %1525 = vsyncadd [#allocation6], 4294958336 }
  0x19   :  { %1526 = dma.done.wait [#allocation9], 16384  }
  0x1a   :  { %1527 = vsyncadd [#allocation9], 4294950912 }
  0x1b   :  { %1528 = dma.done.wait [#allocation12], 4096  }
  0x1c   :  { %1529 = vsyncadd [#allocation12], 4294963200  ;;  %vm215_vm0 = vcmask 1040384   ;;  %v203_v0 = vld [vmem:[#allocation7 + $0x20] sm:$0x1]  ;;  %v201_v2 = vld [vmem:[#allocation7 + $0x10] sm:$0xff] }
  0x1d   :  { %v204_v1 = vld [vmem:[#allocation7 + $0x28] sm:$0x1]  ;;  %1258 = vmatpush.msk.msra.mxu0 %vm215_vm0, %v203_v0  ;;  %v202_v3 = vld [vmem:[#allocation7 + $0x18] sm:$0xff]  ;;  %v199_v4 = vld [vmem:[#allocation7] sm:$0xff]  ;;  %vm211_vm1 = vcmask 138240   ;;  %s1542_s20 = smov [#allocation13]  }
  0x1e   :  { %1260 = vmatpush.msk.msra.mxu1 %vm215_vm0, %v204_v1  ;;  %v200_v5 = vld [vmem:[#allocation7 + $0x8] sm:$0xff]  ;;  %v1638_v6 = vld [vmem:[#allocation5 + $0xf0] sm:$0xff]  ;;  %v198_v8 = vld [vmem:[#allocation2] sm:$0xff]  ;;  %s1243_s21 = sshll.u32 %s1542_s20, 4  ;;  %s1244_s21 = int_to_ptr.vmem [resolvable:$true] %s1243_s21 }
  0x1f   :  { %v1640_v7 = vld [vmem:[#allocation5 + $0x1f0] sm:$0xff]  ;;  %236 = vmatpush.msra.mxu0 %v201_v2  ;;  %262 = vmatpush.msra.mxu2 %v1638_v6  ;;  %v1644_v9 = vld [vmem:[#allocation5 + $0xf8] sm:$0xff]  ;;  %v1648_v11 = vld [vmem:[#allocation5 + $0xe0] sm:$0xff] }
  0x20   :  { %256 = vmatpush.msra.mxu1 %v202_v3  ;;  %282 = vmatpush.msra.mxu3 %v1640_v7  ;;  %v1646_v10 = vld [vmem:[#allocation5 + $0x1f8] sm:$0xff]  ;;  %v1650_v12 = vld [vmem:[#allocation5 + $0x1e0] sm:$0xff]  ;;  %v1652_v13 = vld [vmem:[#allocation5 + $0xe8] sm:$0xff] }
  0x21   :  { %237 = vmatpush.msra.mxu0 %v199_v4  ;;  %v1654_v14 = vld [vmem:[#allocation5 + $0x1e8] sm:$0xff]  ;;  %v1658_v15 = vld [vmem:[#allocation5 + $0xd0] sm:$0xff]  ;;  %263 = vmatpush.msra.mxu2 %v1648_v11  ;;  %v1664_v17 = vld [vmem:[#allocation5 + $0xd8] sm:$0xff] }
  0x22   :  { %257 = vmatpush.msra.mxu1 %v200_v5  ;;  %1259 = vmatmul.msk.f32.vlgmr.msra.gmra.mxu0 %vm211_vm1, %v198_v8  ;;  %v1660_v16 = vld [vmem:[#allocation5 + $0x1d0] sm:$0xff]  ;;  %v1666_v18 = vld [vmem:[#allocation5 + $0x1d8] sm:$0xff]  ;;  %v1670_v19 = vld [vmem:[#allocation5 + $0xc0] sm:$0xff] }
  0x23   :  { %1261 = vmatmul.msk.f32.vlgmr.msra.gmra.mxu1 %vm211_vm1, %v198_v8  ;;  %302 = vmatpush.msrb.mxu0 %v1644_v9  ;;  %v1672_v20 = vld [vmem:[#allocation5 + $0x1c0] sm:$0xff]  ;;  %v1676_v21 = vld [vmem:[#allocation5 + $0xc8] sm:$0xff]  ;;  %v1682_v23 = vld [vmem:[#allocation5 + $0xb0] sm:$0xff] }
  0x24   :  { %322 = vmatpush.msrb.mxu1 %v1646_v10  ;;  %283 = vmatpush.msra.mxu3 %v1650_v12  ;;  %v1678_v22 = vld [vmem:[#allocation5 + $0x1c8] sm:$0xff]  ;;  %v1684_v24 = vld [vmem:[#allocation5 + $0x1b0] sm:$0xff]  ;;  %v1688_v25 = vld [vmem:[#allocation5 + $0xb8] sm:$0xff] }
  0x25   :  { %303 = vmatpush.msrb.mxu0 %v1652_v13  ;;  %264 = vmatpush.msra.mxu2 %v1658_v15  ;;  %v1690_v26 = vld [vmem:[#allocation5 + $0x1b8] sm:$0xff]  ;;  %v1694_v27 = vld [vmem:[#allocation5 + $0xa0] sm:$0xff]  ;;  %v1700_v29 = vld [vmem:[#allocation5 + $0xa8] sm:$0xff] }
  0x26   :  { %323 = vmatpush.msrb.mxu1 %v1654_v14  ;;  %284 = vmatpush.msra.mxu3 %v1660_v16  ;;  %v1696_v28 = vld [vmem:[#allocation5 + $0x1a0] sm:$0xff]  ;;  %v1702_v30 = vld [vmem:[#allocation5 + $0x1a8] sm:$0xff]  ;;  %v1706_v31 = vld [vmem:[#allocation5 + $0x90] sm:$0xff] }
  0x27   :  { %304 = vmatpush.msrb.mxu0 %v1664_v17  ;;  %265 = vmatpush.msra.mxu2 %v1670_v19  ;;  %v1708_v32 = vld [vmem:[#allocation5 + $0x190] sm:$0xff]  ;;  %v1712_v33 = vld [vmem:[#allocation5 + $0x98] sm:$0xff]  ;;  %v1718_v35 = vld [vmem:[#allocation5 + $0x80] sm:$0xff] }
  0x28   :  { %324 = vmatpush.msrb.mxu1 %v1666_v18  ;;  %285 = vmatpush.msra.mxu3 %v1672_v20  ;;  %v1714_v34 = vld [vmem:[#allocation5 + $0x198] sm:$0xff]  ;;  %v1720_v36 = vld [vmem:[#allocation5 + $0x180] sm:$0xff]  ;;  %v1724_v37 = vld [vmem:[#allocation5 + $0x88] sm:$0xff] }
  0x29   :  { %305 = vmatpush.msrb.mxu0 %v1676_v21  ;;  %266 = vmatpush.msra.mxu2 %v1682_v23  ;;  %v1726_v38 = vld [vmem:[#allocation5 + $0x188] sm:$0xff]  ;;  %v1730_v39 = vld [vmem:[#allocation5 + $0x70] sm:$0xff]  ;;  %v1736_v41 = vld [vmem:[#allocation5 + $0x78] sm:$0xff] }
  0x2a   :  { %325 = vmatpush.msrb.mxu1 %v1678_v22  ;;  %286 = vmatpush.msra.mxu3 %v1684_v24  ;;  %v1732_v40 = vld [vmem:[#allocation5 + $0x170] sm:$0xff]  ;;  %v1738_v42 = vld [vmem:[#allocation5 + $0x178] sm:$0xff]  ;;  %v1742_v43 = vld [vmem:[#allocation5 + $0x60] sm:$0xff] }
  0x2b   :  { %306 = vmatpush.msrb.mxu0 %v1688_v25  ;;  %267 = vmatpush.msra.mxu2 %v1694_v27  ;;  %v1744_v44 = vld [vmem:[#allocation5 + $0x160] sm:$0xff]  ;;  %v1748_v45 = vld [vmem:[#allocation5 + $0x68] sm:$0xff]  ;;  %v1752_v47 = vld [vmem:[#allocation5 + $0x50] sm:$0xff] }
  0x2c   :  { %326 = vmatpush.msrb.mxu1 %v1690_v26  ;;  %287 = vmatpush.msra.mxu3 %v1696_v28  ;;  %v1750_v46 = vld [vmem:[#allocation5 + $0x168] sm:$0xff]  ;;  %v1756_v48 = vld [vmem:[#allocation5 + $0x150] sm:$0xff]  ;;  %v1758_v49 = vld [vmem:[#allocation5 + $0x58] sm:$0xff] }
  0x2d   :  { %307 = vmatpush.msrb.mxu0 %v1700_v29  ;;  %268 = vmatpush.msra.mxu2 %v1706_v31  ;;  %2427 = vst [vmem:[#allocation19_spill] sm:$0xff] %v1758_v49  ;;  %v1762_v50 = vld [vmem:[#allocation5 + $0x158] sm:$0xff]  ;;  %v1766_v51 = vld [vmem:[#allocation5 + $0x40] sm:$0xff]  ;;  %v1772_v53 = vld [vmem:[#allocation5 + $0x48] sm:$0xff] }
  0x2e   :  { %327 = vmatpush.msrb.mxu1 %v1702_v30  ;;  %288 = vmatpush.msra.mxu3 %v1708_v32  ;;  %2428 = vst [vmem:[#allocation20_spill] sm:$0xff] %v1766_v51  ;;  %v1768_v52 = vld [vmem:[#allocation5 + $0x140] sm:$0xff]  ;;  %v1774_v54 = vld [vmem:[#allocation5 + $0x148] sm:$0xff]  ;;  %v1778_v55 = vld [vmem:[#allocation5 + $0x30] sm:$0xff] }
  0x2f   :  { %308 = vmatpush.msrb.mxu0 %v1712_v33  ;;  %269 = vmatpush.msra.mxu2 %v1718_v35  ;;  %2429 = vst [vmem:[#allocation21_spill] sm:$0xff] %v1772_v53  ;;  %v1780_v56 = vld [vmem:[#allocation5 + $0x130] sm:$0xff]  ;;  %v1784_v57 = vld [vmem:[#allocation5 + $0x38] sm:$0xff]  ;;  %v1790_v59 = vld [vmem:[#allocation5 + $0x20] sm:$0xff] }
  0x30   :  { %328 = vmatpush.msrb.mxu1 %v1714_v34  ;;  %289 = vmatpush.msra.mxu3 %v1720_v36  ;;  %2430 = vst [vmem:[#allocation22_spill] sm:$0xff] %v1778_v55  ;;  %v1786_v58 = vld [vmem:[#allocation5 + $0x138] sm:$0xff]  ;;  %v1792_v60 = vld [vmem:[#allocation5 + $0x120] sm:$0xff]  ;;  %v1796_v61 = vld [vmem:[#allocation5 + $0x28] sm:$0xff] }
  0x31   :  { %309 = vmatpush.msrb.mxu0 %v1724_v37  ;;  %270 = vmatpush.msra.mxu2 %v1730_v39  ;;  %2431 = vst [vmem:[#allocation23_spill] sm:$0xff] %v1784_v57  ;;  %v1798_v62 = vld [vmem:[#allocation5 + $0x128] sm:$0xff]  ;;  %v1802_v63 = vld [vmem:[#allocation5 + $0x10] sm:$0xff]  ;;  %v1808_v1 = vld [vmem:[#allocation5 + $0x18] sm:$0xff] }
  0x32   :  { %329 = vmatpush.msrb.mxu1 %v1726_v38  ;;  %290 = vmatpush.msra.mxu3 %v1732_v40  ;;  %2432 = vst [vmem:[#allocation24_spill] sm:$0xff] %v1786_v58  ;;  %v1804_v0 = vld [vmem:[#allocation5 + $0x110] sm:$0xff]  ;;  %v1810_v2 = vld [vmem:[#allocation5 + $0x118] sm:$0xff]  ;;  %v1814_v3 = vld [vmem:[#allocation5] sm:$0xff] }
  0x33   :  { %310 = vmatpush.msrb.mxu0 %v1736_v41  ;;  %271 = vmatpush.msra.mxu2 %v1742_v43  ;;  %2433 = vst [vmem:[#allocation25_spill] sm:$0xff] %v1790_v59  ;;  %v1816_v4 = vld [vmem:[#allocation5 + $0x100] sm:$0xff]  ;;  %v1820_v5 = vld [vmem:[#allocation5 + $0x8] sm:$0xff] }
  0x34   :  { %330 = vmatpush.msrb.mxu1 %v1738_v42  ;;  %291 = vmatpush.msra.mxu3 %v1744_v44  ;;  %2434 = vst [vmem:[#allocation26_spill] sm:$0xff] %v1792_v60  ;;  %v1822_v8 = vld [vmem:[#allocation5 + $0x108] sm:$0xff] }
  0x35   :  { %311 = vmatpush.msrb.mxu0 %v1748_v45  ;;  %272 = vmatpush.msra.mxu2 %v1752_v47  ;;  %2435 = vst [vmem:[#allocation27_spill] sm:$0xff] %v1796_v61 }
  0x36   :  { %331 = vmatpush.msrb.mxu1 %v1750_v46  ;;  %292 = vmatpush.msra.mxu3 %v1756_v48  ;;  %2436 = vst [vmem:[#allocation28_spill] sm:$0xff] %v1798_v62 }
  0x37   :  { %312 = vmatpush.msrb.mxu0 %v1758_v49  ;;  %273 = vmatpush.msra.mxu2 %v1766_v51  ;;  %2437 = vst [vmem:[#allocation29_spill] sm:$0xff] %v1802_v63 }
  0x38   :  { %332 = vmatpush.msrb.mxu1 %v1762_v50  ;;  %293 = vmatpush.msra.mxu3 %v1768_v52  ;;  %2438 = vst [vmem:[#allocation30_spill] sm:$0xff] %v1804_v0 }
  0x39   :  { %313 = vmatpush.msrb.mxu0 %v1772_v53  ;;  %274 = vmatpush.msra.mxu2 %v1778_v55  ;;  %2439 = vst [vmem:[#allocation31_spill] sm:$0xff] %v1808_v1 }
  0x3a   :  { %333 = vmatpush.msrb.mxu1 %v1774_v54  ;;  %294 = vmatpush.msra.mxu3 %v1780_v56  ;;  %2440 = vst [vmem:[#allocation32_spill] sm:$0xff] %v1810_v2 }
  0x3b   :  { %314 = vmatpush.msrb.mxu0 %v1784_v57  ;;  %275 = vmatpush.msra.mxu2 %v1790_v59  ;;  %2441 = vst [vmem:[#allocation33_spill] sm:$0xff] %v1814_v3 }
  0x3c   :  { %334 = vmatpush.msrb.mxu1 %v1786_v58  ;;  %295 = vmatpush.msra.mxu3 %v1792_v60  ;;  %2442 = vst [vmem:[#allocation34_spill] sm:$0xff] %v1816_v4 }
  0x3d   :  { %315 = vmatpush.msrb.mxu0 %v1796_v61  ;;  %276 = vmatpush.msra.mxu2 %v1802_v63  ;;  %2443 = vst [vmem:[#allocation35_spill] sm:$0xff] %v1820_v5 }
  0x3e   :  { %335 = vmatpush.msrb.mxu1 %v1798_v62  ;;  %296 = vmatpush.msra.mxu3 %v1804_v0  ;;  %2444 = vst [vmem:[#allocation36_spill] sm:$0xff] %v1822_v8 }
  0x3f   :  { %316 = vmatpush.msrb.mxu0 %v1808_v1  ;;  %277 = vmatpush.msra.mxu2 %v1814_v3 }
  0x40   :  { %336 = vmatpush.msrb.mxu1 %v1810_v2  ;;  %297 = vmatpush.msra.mxu3 %v1816_v4 }
  0x41   :  { %317 = vmatpush.msrb.mxu0 %v1820_v5  ;;  %344 = vmatpush.msrb.mxu2 %v1638_v6 }
  0x42   :  { %337 = vmatpush.msrb.mxu1 %v1822_v8  ;;  %364 = vmatpush.msrb.mxu3 %v1640_v7 }
  0x43   :  { %384 = vmatpush.msra.mxu0 %v1644_v9  ;;  %345 = vmatpush.msrb.mxu2 %v1648_v11 }
  0x44   :  { %404 = vmatpush.msra.mxu1 %v1646_v10  ;;  %365 = vmatpush.msrb.mxu3 %v1650_v12 }
  0x45   :  { %385 = vmatpush.msra.mxu0 %v1652_v13  ;;  %346 = vmatpush.msrb.mxu2 %v1658_v15 }
  0x46   :  { %405 = vmatpush.msra.mxu1 %v1654_v14  ;;  %366 = vmatpush.msrb.mxu3 %v1660_v16 }
  0x47   :  { %386 = vmatpush.msra.mxu0 %v1664_v17  ;;  %347 = vmatpush.msrb.mxu2 %v1670_v19 }
  0x48   :  { %406 = vmatpush.msra.mxu1 %v1666_v18  ;;  %367 = vmatpush.msrb.mxu3 %v1672_v20 }
  0x49   :  { %387 = vmatpush.msra.mxu0 %v1676_v21  ;;  %348 = vmatpush.msrb.mxu2 %v1682_v23 }
  0x4a   :  { %407 = vmatpush.msra.mxu1 %v1678_v22  ;;  %368 = vmatpush.msrb.mxu3 %v1684_v24 }
  0x4b   :  { %388 = vmatpush.msra.mxu0 %v1688_v25  ;;  %349 = vmatpush.msrb.mxu2 %v1694_v27 }
  0x4c   :  { %408 = vmatpush.msra.mxu1 %v1690_v26  ;;  %369 = vmatpush.msrb.mxu3 %v1696_v28 }
  0x4d   :  { %389 = vmatpush.msra.mxu0 %v1700_v29  ;;  %350 = vmatpush.msrb.mxu2 %v1706_v31 }
  0x4e   :  { %409 = vmatpush.msra.mxu1 %v1702_v30  ;;  %370 = vmatpush.msrb.mxu3 %v1708_v32 }
  0x4f   :  { %390 = vmatpush.msra.mxu0 %v1712_v33  ;;  %351 = vmatpush.msrb.mxu2 %v1718_v35 }
  0x50   :  { %410 = vmatpush.msra.mxu1 %v1714_v34  ;;  %371 = vmatpush.msrb.mxu3 %v1720_v36 }
  0x51   :  { %391 = vmatpush.msra.mxu0 %v1724_v37  ;;  %352 = vmatpush.msrb.mxu2 %v1730_v39 }
  0x52   :  { %411 = vmatpush.msra.mxu1 %v1726_v38  ;;  %372 = vmatpush.msrb.mxu3 %v1732_v40 }
  0x53   :  { %392 = vmatpush.msra.mxu0 %v1736_v41  ;;  %353 = vmatpush.msrb.mxu2 %v1742_v43 }
  0x54   :  { %412 = vmatpush.msra.mxu1 %v1738_v42  ;;  %373 = vmatpush.msrb.mxu3 %v1744_v44 }
  0x55   :  { %393 = vmatpush.msra.mxu0 %v1748_v45  ;;  %354 = vmatpush.msrb.mxu2 %v1752_v47 }
  0x56   :  { %413 = vmatpush.msra.mxu1 %v1750_v46  ;;  %374 = vmatpush.msrb.mxu3 %v1756_v48 }
  0x57   :  { %394 = vmatpush.msra.mxu0 %v1758_v49  ;;  %355 = vmatpush.msrb.mxu2 %v1766_v51 }
  0x58   :  { %414 = vmatpush.msra.mxu1 %v1762_v50  ;;  %375 = vmatpush.msrb.mxu3 %v1768_v52 }
  0x59   :  { %395 = vmatpush.msra.mxu0 %v1772_v53  ;;  %356 = vmatpush.msrb.mxu2 %v1778_v55 }
  0x5a   :  { %415 = vmatpush.msra.mxu1 %v1774_v54  ;;  %376 = vmatpush.msrb.mxu3 %v1780_v56 }
  0x5b   :  { %396 = vmatpush.msra.mxu0 %v1784_v57  ;;  %357 = vmatpush.msrb.mxu2 %v1790_v59 }
  0x5c   :  { %416 = vmatpush.msra.mxu1 %v1786_v58  ;;  %377 = vmatpush.msrb.mxu3 %v1792_v60  ;;  %v465_v60 = vld [vmem:[#allocation8 + $0x38] sm:$0xff] }
  0x5d   :  { %397 = vmatpush.msra.mxu0 %v1796_v61  ;;  %358 = vmatpush.msrb.mxu2 %v1802_v63  ;;  %v205_v61 = vld [vmem:[%s2380_s3] sm:$0x3] }
  0x5e   :  { %417 = vmatpush.msra.mxu1 %v1798_v62  ;;  %378 = vmatpush.msrb.mxu3 %v1804_v0  ;;  %v207_v59 = vperm.slane %v205_v61, 0  ;;  %v208_v63 = vperm.slane %v205_v61, 1  ;;  %v515_v0 = vld [vmem:[#allocation8 + $0x1c8] sm:$0xff]  ;;  %v493_v62 = vld [vmem:[#allocation8 + $0x118] sm:$0xff] }
  0x5f   :  { %398 = vmatpush.msra.mxu0 %v1808_v1  ;;  %359 = vmatpush.msrb.mxu2 %v1814_v3  ;;  %v516_v3 = vld [vmem:[#allocation8 + $0x1d0] sm:$0xff] }
  0x60   :  { %418 = vmatpush.msra.mxu1 %v1810_v2  ;;  %379 = vmatpush.msrb.mxu3 %v1816_v4  ;;  %v488_v4 = vld [vmem:[#allocation8 + $0xf0] sm:$0xff]  ;;  %v489_v2 = vld [vmem:[#allocation8 + $0xf8] sm:$0xff] }
  0x61   :  { %399 = vmatpush.msra.mxu0 %v1820_v5 }
  0x62   :  { %419 = vmatpush.msra.mxu1 %v1822_v8  ;;  %v517_v8 = vld [vmem:[#allocation8 + $0x1d8] sm:$0xff] }
  0x9f   :  { %v239_v57 = vpop.f32.mrf.mxu0 }
  0xa0   :  { %v259_v55 = vpop.f32.mrf.mxu1  ;;  %v1897_v53 = vadd.f32 %v239_v57, %v207_v59  ;;  %v521_v57 = vld [vmem:[#allocation8 + $0x1f8] sm:$0xff]  ;;  %v518_v59 = vld [vmem:[#allocation8 + $0x1e0] sm:$0xff] }
  0xa1   :  { %v1899_v1 = vadd.f32 %v259_v55, %v208_v63  ;;  %v520_v55 = vld [vmem:[#allocation8 + $0x1f0] sm:$0xff]  ;;  %v519_v63 = vld [vmem:[#allocation8 + $0x1e8] sm:$0xff] }
  0xa2   :  { %2445 = vst [vmem:[#allocation37_spill] sm:$0xff] %v1897_v53  ;;  %278 = vmatmul.f32.vlgmr.msra.gmra.mxu2 %v1897_v53  ;;  %318 = vmatmul.f32.vlgmr.msrb.gmra.mxu0 %v1897_v53  ;;  %v342_v5 = vmul.f32 %v1897_v53, %v1897_v53  ;;  %v514_v53 = vld [vmem:[#allocation8 + $0x1c0] sm:$0xff] }
  0xa3   :  { %298 = vmatmul.f32.vlgmr.msra.gmra.mxu3 %v1899_v1  ;;  %338 = vmatmul.f32.vlgmr.msrb.gmra.mxu1 %v1899_v1  ;;  %v343_v61 = vmul.f32 %v1899_v1, %v1899_v1 }
  0xa4   :  { %548 = vmatpush.msra.mxu3 %v520_v55  ;;  %588 = vmatpush.msrb.mxu1 %v521_v57  ;;  %v487_v55 = vld [vmem:[#allocation8 + $0xe8] sm:$0xff]  ;;  %v513_v57 = vld [vmem:[#allocation8 + $0x1b8] sm:$0xff] }
  0xa5   :  { %528 = vmatpush.msra.mxu2 %v488_v4  ;;  %568 = vmatpush.msrb.mxu0 %v489_v2  ;;  %v508_v4 = vld [vmem:[#allocation8 + $0x190] sm:$0xff]  ;;  %v483_v2 = vld [vmem:[#allocation8 + $0xc8] sm:$0xff] }
  0xa6   :  { %549 = vmatpush.msra.mxu3 %v518_v59  ;;  %589 = vmatpush.msrb.mxu1 %v519_v63  ;;  %v484_v59 = vld [vmem:[#allocation8 + $0xd0] sm:$0xff]  ;;  %v510_v63 = vld [vmem:[#allocation8 + $0x1a0] sm:$0xff] }
  0xa7   :  { %569 = vmatpush.msrb.mxu0 %v487_v55  ;;  %v481_v55 = vld [vmem:[#allocation8 + $0xb8] sm:$0xff] }
  0xa8   :  { %550 = vmatpush.msra.mxu3 %v516_v3  ;;  %590 = vmatpush.msrb.mxu1 %v517_v8  ;;  %v485_v3 = vld [vmem:[#allocation8 + $0xd8] sm:$0xff]  ;;  %v511_v8 = vld [vmem:[#allocation8 + $0x1a8] sm:$0xff] }
  0xa9   :  { %570 = vmatpush.msrb.mxu0 %v485_v3  ;;  %v479_v3 = vld [vmem:[#allocation8 + $0xa8] sm:$0xff] }
  0xaa   :  { %360 = vmatmul.f32.vlgmr.msrb.gmra.mxu2 %v342_v5  ;;  %400 = vmatmul.f32.vlgmr.msra.gmra.mxu0 %v342_v5  ;;  %v486_v5 = vld [vmem:[#allocation8 + $0xe0] sm:$0xff] }
  0xab   :  { %380 = vmatmul.f32.vlgmr.msrb.gmra.mxu3 %v343_v61  ;;  %420 = vmatmul.f32.vlgmr.msra.gmra.mxu1 %v343_v61  ;;  %v512_v61 = vld [vmem:[#allocation8 + $0x1b0] sm:$0xff] }
  0xac   :  { %551 = vmatpush.msra.mxu3 %v514_v53  ;;  %591 = vmatpush.msrb.mxu1 %v515_v0  ;;  %v482_v53 = vld [vmem:[#allocation8 + $0xc0] sm:$0xff]  ;;  %v509_v0 = vld [vmem:[#allocation8 + $0x198] sm:$0xff] }
  0xad   :  { %529 = vmatpush.msra.mxu2 %v486_v5  ;;  %571 = vmatpush.msrb.mxu0 %v483_v2  ;;  %v480_v5 = vld [vmem:[#allocation8 + $0xb0] sm:$0xff]  ;;  %v477_v2 = vld [vmem:[#allocation8 + $0x98] sm:$0xff] }
  0xae   :  { %552 = vmatpush.msra.mxu3 %v512_v61  ;;  %592 = vmatpush.msrb.mxu1 %v513_v57  ;;  %v506_v61 = vld [vmem:[#allocation8 + $0x180] sm:$0xff]  ;;  %v507_v57 = vld [vmem:[#allocation8 + $0x188] sm:$0xff] }
  0xaf   :  { %530 = vmatpush.msra.mxu2 %v484_v59  ;;  %572 = vmatpush.msrb.mxu0 %v481_v55  ;;  %v478_v59 = vld [vmem:[#allocation8 + $0xa0] sm:$0xff]  ;;  %v475_v55 = vld [vmem:[#allocation8 + $0x88] sm:$0xff] }
  0xb0   :  { %553 = vmatpush.msra.mxu3 %v510_v63  ;;  %593 = vmatpush.msrb.mxu1 %v511_v8  ;;  %v504_v63 = vld [vmem:[#allocation8 + $0x170] sm:$0xff]  ;;  %v505_v8 = vld [vmem:[#allocation8 + $0x178] sm:$0xff] }
  0xb1   :  { %531 = vmatpush.msra.mxu2 %v482_v53  ;;  %573 = vmatpush.msrb.mxu0 %v479_v3  ;;  %v476_v53 = vld [vmem:[#allocation8 + $0x90] sm:$0xff]  ;;  %v473_v3 = vld [vmem:[#allocation8 + $0x78] sm:$0xff] }
  0xb2   :  { %554 = vmatpush.msra.mxu3 %v508_v4  ;;  %594 = vmatpush.msrb.mxu1 %v509_v0  ;;  %v502_v4 = vld [vmem:[#allocation8 + $0x160] sm:$0xff]  ;;  %v503_v0 = vld [vmem:[#allocation8 + $0x168] sm:$0xff] }
  0xb3   :  { %532 = vmatpush.msra.mxu2 %v480_v5  ;;  %574 = vmatpush.msrb.mxu0 %v477_v2  ;;  %v474_v5 = vld [vmem:[#allocation8 + $0x80] sm:$0xff]  ;;  %v471_v2 = vld [vmem:[#allocation8 + $0x68] sm:$0xff] }
  0xb4   :  { %555 = vmatpush.msra.mxu3 %v506_v61  ;;  %595 = vmatpush.msrb.mxu1 %v507_v57  ;;  %v500_v61 = vld [vmem:[#allocation8 + $0x150] sm:$0xff]  ;;  %v501_v57 = vld [vmem:[#allocation8 + $0x158] sm:$0xff] }
  0xb5   :  { %533 = vmatpush.msra.mxu2 %v478_v59  ;;  %575 = vmatpush.msrb.mxu0 %v475_v55  ;;  %v472_v59 = vld [vmem:[#allocation8 + $0x70] sm:$0xff]  ;;  %v494_v55 = vld [vmem:[#allocation8 + $0x120] sm:$0xff] }
  0xb6   :  { %556 = vmatpush.msra.mxu3 %v504_v63  ;;  %596 = vmatpush.msrb.mxu1 %v505_v8  ;;  %v498_v63 = vld [vmem:[#allocation8 + $0x140] sm:$0xff]  ;;  %v499_v8 = vld [vmem:[#allocation8 + $0x148] sm:$0xff] }
  0xb7   :  { %534 = vmatpush.msra.mxu2 %v476_v53  ;;  %576 = vmatpush.msrb.mxu0 %v473_v3  ;;  %v470_v53 = vld [vmem:[#allocation8 + $0x60] sm:$0xff]  ;;  %v492_v3 = vld [vmem:[#allocation8 + $0x110] sm:$0xff] }
  0xb8   :  { %557 = vmatpush.msra.mxu3 %v502_v4  ;;  %597 = vmatpush.msrb.mxu1 %v503_v0  ;;  %v496_v4 = vld [vmem:[#allocation8 + $0x130] sm:$0xff] }
  0xb9   :  { %535 = vmatpush.msra.mxu2 %v474_v5  ;;  %v497_v5 = vld [vmem:[#allocation8 + $0x138] sm:$0xff]  ;;  %577 = vmatpush.msrb.mxu0 %v471_v2  ;;  %v464_v2 = vld [vmem:[#allocation8 + $0x30] sm:$0xff] }
  0xba   :  { %558 = vmatpush.msra.mxu3 %v500_v61  ;;  %598 = vmatpush.msrb.mxu1 %v501_v57  ;;  %v468_v61 = vld [vmem:[#allocation8 + $0x50] sm:$0xff]  ;;  %v469_v57 = vld [vmem:[#allocation8 + $0x58] sm:$0xff] }
  0xbb   :  { %536 = vmatpush.msra.mxu2 %v472_v59  ;;  %v495_v59 = vld [vmem:[#allocation8 + $0x128] sm:$0xff]  ;;  %578 = vmatpush.msrb.mxu0 %v469_v57 }
  0xbc   :  { %559 = vmatpush.msra.mxu3 %v498_v63  ;;  %599 = vmatpush.msrb.mxu1 %v499_v8  ;;  %v466_v63 = vld [vmem:[#allocation8 + $0x40] sm:$0xff]  ;;  %v467_v8 = vld [vmem:[#allocation8 + $0x48] sm:$0xff] }
  0xbd   :  { %537 = vmatpush.msra.mxu2 %v470_v53  ;;  %579 = vmatpush.msrb.mxu0 %v467_v8  ;;  %v463_v57 = vld [vmem:[#allocation8 + $0x28] sm:$0xff]  ;;  %v458_v8 = vld [vmem:[#allocation8] sm:$0xff] }
  0xbe   :  { %560 = vmatpush.msra.mxu3 %v496_v4  ;;  %600 = vmatpush.msrb.mxu1 %v497_v5  ;;  %v490_v5 = vld [vmem:[#allocation8 + $0x100] sm:$0xff] }
  0xbf   :  { %538 = vmatpush.msra.mxu2 %v468_v61  ;;  %v491_v61 = vld [vmem:[#allocation8 + $0x108] sm:$0xff]  ;;  %580 = vmatpush.msrb.mxu0 %v465_v60 }
  0xc0   :  { %561 = vmatpush.msra.mxu3 %v494_v55  ;;  %601 = vmatpush.msrb.mxu1 %v495_v59  ;;  %v462_v55 = vld [vmem:[#allocation8 + $0x20] sm:$0xff]  ;;  %v460_v59 = vld [vmem:[#allocation8 + $0x10] sm:$0xff]  ;;  %v459_v60 = vld [vmem:[#allocation8 + $0x8] sm:$0xff] }
  0xc1   :  { %539 = vmatpush.msra.mxu2 %v466_v63  ;;  %581 = vmatpush.msrb.mxu0 %v463_v57 }
  0xc2   :  { %562 = vmatpush.msra.mxu3 %v492_v3  ;;  %602 = vmatpush.msrb.mxu1 %v493_v62 }
  0xc3   :  { %540 = vmatpush.msra.mxu2 %v464_v2 }
  0xc4   :  { %563 = vmatpush.msra.mxu3 %v490_v5  ;;  %603 = vmatpush.msrb.mxu1 %v491_v61 }
  0xc5   :  { %541 = vmatpush.msra.mxu2 %v462_v55 }
  0xc6   :  { %628 = vmatpush.msrb.mxu3 %v1640_v7  ;;  %668 = vmatpush.msra.mxu1 %v1646_v10 }
  0xc7   :  { %542 = vmatpush.msra.mxu2 %v460_v59 }
  0xc8   :  { %629 = vmatpush.msrb.mxu3 %v1650_v12  ;;  %669 = vmatpush.msra.mxu1 %v1654_v14 }
  0xc9   :  { %543 = vmatpush.msra.mxu2 %v458_v8 }
  0xca   :  { %630 = vmatpush.msrb.mxu3 %v1660_v16  ;;  %670 = vmatpush.msra.mxu1 %v1666_v18 }
  0xcb   :  { %608 = vmatpush.msrb.mxu2 %v1638_v6 }
  0xcc   :  { %631 = vmatpush.msrb.mxu3 %v1672_v20  ;;  %671 = vmatpush.msra.mxu1 %v1678_v22 }
  0xcd   :  { %609 = vmatpush.msrb.mxu2 %v1648_v11 }
  0xce   :  { %632 = vmatpush.msrb.mxu3 %v1684_v24  ;;  %672 = vmatpush.msra.mxu1 %v1690_v26 }
  0xcf   :  { %610 = vmatpush.msrb.mxu2 %v1658_v15 }
  0xd0   :  { %633 = vmatpush.msrb.mxu3 %v1696_v28  ;;  %673 = vmatpush.msra.mxu1 %v1702_v30 }
  0xd1   :  { %611 = vmatpush.msrb.mxu2 %v1670_v19 }
  0xd2   :  { %634 = vmatpush.msrb.mxu3 %v1708_v32  ;;  %674 = vmatpush.msra.mxu1 %v1714_v34 }
  0xd3   :  { %612 = vmatpush.msrb.mxu2 %v1682_v23 }
  0xd4   :  { %635 = vmatpush.msrb.mxu3 %v1720_v36  ;;  %675 = vmatpush.msra.mxu1 %v1726_v38 }
  0xd5   :  { %613 = vmatpush.msrb.mxu2 %v1694_v27 }
  0xd6   :  { %636 = vmatpush.msrb.mxu3 %v1732_v40  ;;  %676 = vmatpush.msra.mxu1 %v1738_v42 }
  0xd7   :  { %614 = vmatpush.msrb.mxu2 %v1706_v31 }
  0xd8   :  { %637 = vmatpush.msrb.mxu3 %v1744_v44  ;;  %677 = vmatpush.msra.mxu1 %v1750_v46 }
  0xd9   :  { %615 = vmatpush.msrb.mxu2 %v1718_v35 }
  0xda   :  { %638 = vmatpush.msrb.mxu3 %v1756_v48  ;;  %678 = vmatpush.msra.mxu1 %v1762_v50 }
  0xdb   :  { %616 = vmatpush.msrb.mxu2 %v1730_v39 }
  0xdc   :  { %639 = vmatpush.msrb.mxu3 %v1768_v52  ;;  %679 = vmatpush.msra.mxu1 %v1774_v54 }
  0xdd   :  { %617 = vmatpush.msrb.mxu2 %v1742_v43 }
  0xde   :  { %640 = vmatpush.msrb.mxu3 %v1780_v56  ;;  %680 = vmatpush.msra.mxu1 %v1786_v58  ;;  %v2451_v58 = vld [vmem:[#allocation21_spill] sm:$0xff] }
  0xdf   :  { %618 = vmatpush.msrb.mxu2 %v1752_v47 }
 0x11f   :  { %v319_v0 = vpop.f32.mrf.mxu0 }
 0x120   :  { %v339_v51 = vpop.f32.mrf.mxu1 }
 0x121   :  { %v1909_v49 = vadd.f32 %v339_v51, %v319_v0  ;;  %v461_v51 = vld [vmem:[#allocation8 + $0x18] sm:$0xff] }
 0x122   :  { %582 = vmatpush.msrb.mxu0 %v461_v51 }
 0x123   :  { %v425_v62 = vmul.f32 %v1909_v49, %v1909_v49 }
 0x124   :  { %583 = vmatpush.msrb.mxu0 %v459_v60 }
 0x125   :  { %v279_v53 = vpop.f32.mrf.mxu2 }
 0x126   :  { %v299_v4 = vpop.f32.mrf.mxu3  ;;  %648 = vmatpush.msra.mxu0 %v1644_v9 }
 0x127   :  { %v401_v63 = vpop.f32.mrf.mxu0  ;;  %v1915_v2 = vadd.f32 %v299_v4, %v279_v53 }
 0x128   :  { %v421_v3 = vpop.f32.mrf.mxu1  ;;  %649 = vmatpush.msra.mxu0 %v1652_v13 }
 0x129   :  { %v422_v0 = vadd.f32 %v421_v3, %v401_v63  ;;  %v424_v53 = vmul.f32 %v1915_v2, %v1915_v2 }
 0x12a   :  { %650 = vmatpush.msra.mxu0 %v1664_v17 }
 0x12b   :  { %v427_v5 = vsub.f32 %v422_v0, %v425_v62 }
 0x12c   :  { %651 = vmatpush.msra.mxu0 %v1676_v21 }
 0x12d   :  { %v429_v61 = vmax.f32 %v427_v5, 0.0  ;;  %v361_v55 = vpop.f32.mrf.mxu2 }
 0x12e   :  { %v381_v63 = vpop.f32.mrf.mxu3  ;;  %652 = vmatpush.msra.mxu0 %v1688_v25 }
 0x12f   :  { %v382_v4 = vadd.f32 %v381_v63, %v361_v55  ;;  %v433_v57 = vadd.f32 1e-05, %v429_v61 }
 0x130   :  { %653 = vmatpush.msra.mxu0 %v1700_v29 }
 0x131   :  { %v426_v59 = vsub.f32 %v382_v4, %v424_v53  ;;  %1276 = vrsqrt.f32 %v433_v57  ;;  %vm450_vm3 = vweird.f32 %v433_v57  ;;  %v431_v4 = vsub.f32 %v1899_v1, %v1909_v49  ;;  %v2450_v49 = vld [vmem:[#allocation30_spill] sm:$0xff] }
 0x132   :  { %654 = vmatpush.msra.mxu0 %v1712_v33 }
 0x133   :  { %v428_v3 = vmax.f32 %v426_v59, 0.0 }
 0x134   :  { %655 = vmatpush.msra.mxu0 %v1724_v37 }
 0x135   :  { %v432_v51 = vadd.f32 1e-05, %v428_v3 }
 0x136   :  { %656 = vmatpush.msra.mxu0 %v1736_v41 }
 0x137   :  { %1278 = vrsqrt.f32 %v432_v51  ;;  %v1277_v62 = vpop.eup %1276  ;;  %vm440_vm6 = vweird.f32 %v432_v51 }
 0x138   :  { %v445_v0 = vmul.f32 %v1277_v62, %v433_v57  ;;  %vm451_vm2 = vweird.f32 %v1277_v62  ;;  %657 = vmatpush.msra.mxu0 %v1748_v45 }
 0x139   :  { %vm452_vm4 = vmor %vm450_vm3, %vm451_vm2 }
 0x13a   :  { %v446_v8 = vmul.f32 %v1277_v62, %v445_v0  ;;  %v2446_v0 = vld [vmem:[#allocation26_spill] sm:$0xff] }
 0x13b   :  { %641 = vmatpush.msrb.mxu3 %v2446_v0 }
 0x13c   :  { %v447_v5 = vmul.f32 0.5, %v446_v8 }
 0x13d   :  { %v1279_v60 = vpop.eup %1278  ;;  %642 = vmatpush.msrb.mxu3 %v2450_v49  ;;  %v2456_v49 = vld [vmem:[#allocation23_spill] sm:$0xff] }
 0x13e   :  { %v435_v61 = vmul.f32 %v1279_v60, %v432_v51  ;;  %v448_v55 = vsub.f32 1.5, %v447_v5  ;;  %vm441_vm5 = vweird.f32 %v1279_v60  ;;  %v2447_v5 = vld [vmem:[#allocation19_spill] sm:$0xff]  ;;  %v2457_v51 = vld [vmem:[#allocation36_spill] sm:$0xff] }
 0x13f   :  { %658 = vmatpush.msra.mxu0 %v2447_v5  ;;  %vm442_vm7 = vmor %vm440_vm6, %vm441_vm5 }
 0x140   :  { %v436_v63 = vmul.f32 %v1279_v60, %v435_v61  ;;  %v449_v53 = vmul.f32 %v1277_v62, %v448_v55  ;;  %v2448_v61 = vld [vmem:[#allocation28_spill] sm:$0xff] }
 0x141   :  { %681 = vmatpush.msra.mxu1 %v2448_v61  ;;  %v2449_v55 = vld [vmem:[#allocation20_spill] sm:$0xff]  ;;  %659 = vmatpush.msra.mxu0 %v2451_v58 }
 0x142   :  { %v437_v59 = vmul.f32 0.5, %v436_v63  ;;  %v453_v3 = vsel %vm452_vm4, %v1277_v62, %v449_v53  ;;  %619 = vmatpush.msrb.mxu2 %v2449_v55  ;;  %v2452_v62 = vld [vmem:[#allocation32_spill] sm:$0xff]  ;;  %v2453_v53 = vld [vmem:[#allocation37_spill] sm:$0xff] }
 0x143   :  { %v455_v57 = vmul.f32 %v453_v3, %v431_v4  ;;  %682 = vmatpush.msra.mxu1 %v2452_v62  ;;  %v2454_v4 = vld [vmem:[#allocation22_spill] sm:$0xff]  ;;  %660 = vmatpush.msra.mxu0 %v2456_v49 }
 0x144   :  { %v438_v8 = vsub.f32 1.5, %v437_v59  ;;  %v430_v59 = vsub.f32 %v2453_v53, %v1915_v2  ;;  %620 = vmatpush.msrb.mxu2 %v2454_v4  ;;  %v2455_v3 = vld [vmem:[#allocation34_spill] sm:$0xff]  ;;  %v2459_v2 = vld [vmem:[#allocation27_spill] sm:$0xff]  ;;  %v846_v53 = vld [vmem:[#allocation10 + $0x150] sm:$0xff] }
 0x145   :  { %v457_v63 = vmax.f32 %v455_v57, 0.0  ;;  %643 = vmatpush.msrb.mxu3 %v2455_v3  ;;  %683 = vmatpush.msra.mxu1 %v2457_v51  ;;  %v2458_v57 = vld [vmem:[#allocation25_spill] sm:$0xff] }
 0x146   :  { %v439_v1 = vmul.f32 %v1279_v60, %v438_v8  ;;  %621 = vmatpush.msrb.mxu2 %v2458_v57  ;;  %661 = vmatpush.msra.mxu0 %v2459_v2 }
 0x147   :  { %564 = vmatmul.f32.vlgmr.msra.gmra.mxu3 %v457_v63  ;;  %604 = vmatmul.f32.vlgmr.msrb.gmra.mxu1 %v457_v63  ;;  %v849_v63 = vld [vmem:[#allocation10 + $0x168] sm:$0xff] }
 0x148   :  { %v443_v55 = vsel %vm442_vm7, %v1279_v60, %v439_v1  ;;  %710 = vmatpush.msra.mxu3 %v1640_v7  ;;  %750 = vmatpush.msrb.mxu1 %v1646_v10  ;;  %v2460_v60 = vld [vmem:[#allocation29_spill] sm:$0xff]  ;;  %v2463_v10 = vld [vmem:[#allocation35_spill] sm:$0xff] }
 0x149   :  { %v454_v61 = vmul.f32 %v443_v55, %v430_v59  ;;  %622 = vmatpush.msrb.mxu2 %v2460_v60  ;;  %v2461_v55 = vld [vmem:[#allocation31_spill] sm:$0xff]  ;;  %v2462_v7 = vld [vmem:[#allocation33_spill] sm:$0xff] }
 0x14a   :  { %711 = vmatpush.msra.mxu3 %v1650_v12  ;;  %751 = vmatpush.msrb.mxu1 %v1654_v14  ;;  %v2467_v12 = vld [vmem:[#allocation30_spill] sm:$0xff]  ;;  %v823_v1 = vld [vmem:[#allocation10 + $0x98] sm:$0xff]  ;;  %v821_v59 = vld [vmem:[#allocation10 + $0x88] sm:$0xff] }
 0x14b   :  { %v456_v8 = vmax.f32 %v454_v61, 0.0  ;;  %662 = vmatpush.msra.mxu0 %v2461_v55  ;;  %623 = vmatpush.msrb.mxu2 %v2462_v7  ;;  %v822_v61 = vld [vmem:[#allocation10 + $0x90] sm:$0xff] }
 0x14c   :  { %712 = vmatpush.msra.mxu3 %v1660_v16  ;;  %752 = vmatpush.msrb.mxu1 %v1666_v18 }
 0x14d   :  { %544 = vmatmul.f32.vlgmr.msra.gmra.mxu2 %v456_v8  ;;  %584 = vmatmul.f32.vlgmr.msrb.gmra.mxu0 %v456_v8  ;;  %v844_v8 = vld [vmem:[#allocation10 + $0x140] sm:$0xff] }
 0x14e   :  { %663 = vmatpush.msra.mxu0 %v2463_v10  ;;  %690 = vmatpush.msra.mxu2 %v1638_v6  ;;  %v2464_v6 = vld [vmem:[#allocation24_spill] sm:$0xff] }
 0x14f   :  { %713 = vmatpush.msra.mxu3 %v1672_v20  ;;  %753 = vmatpush.msrb.mxu1 %v1678_v22 }
 0x150   :  { %730 = vmatpush.msrb.mxu0 %v1644_v9  ;;  %691 = vmatpush.msra.mxu2 %v1648_v11  ;;  %v2465_v9 = vld [vmem:[#allocation28_spill] sm:$0xff] }
 0x151   :  { %714 = vmatpush.msra.mxu3 %v1684_v24  ;;  %754 = vmatpush.msrb.mxu1 %v1690_v26  ;;  %v2466_v11 = vld [vmem:[#allocation20_spill] sm:$0xff] }
 0x152   :  { %731 = vmatpush.msrb.mxu0 %v1652_v13  ;;  %692 = vmatpush.msra.mxu2 %v1658_v15  ;;  %v522_v13 = vld [vmem:[%s2382_s5] sm:$0x3]  ;;  %v866_v26 = vld [vmem:[#allocation10 + $0x1f0] sm:$0xff] }
 0x153   :  { %715 = vmatpush.msra.mxu3 %v1696_v28  ;;  %755 = vmatpush.msrb.mxu1 %v1702_v30  ;;  %v525_v14 = vperm.slane %v522_v13, 1  ;;  %v864_v28 = vld [vmem:[#allocation10 + $0x1e0] sm:$0xff]  ;;  %v862_v30 = vld [vmem:[#allocation10 + $0x1d0] sm:$0xff] }
 0x154   :  { %732 = vmatpush.msrb.mxu0 %v1664_v17  ;;  %693 = vmatpush.msra.mxu2 %v1670_v19  ;;  %v524_v19 = vperm.slane %v522_v13, 0  ;;  %v841_v13 = vld [vmem:[#allocation10 + $0x128] sm:$0xff] }
 0x155   :  { %716 = vmatpush.msra.mxu3 %v1708_v32  ;;  %756 = vmatpush.msrb.mxu1 %v1714_v34  ;;  %v834_v32 = vld [vmem:[#allocation10 + $0xf0] sm:$0xff]  ;;  %v835_v34 = vld [vmem:[#allocation10 + $0xf8] sm:$0xff] }
 0x156   :  { %733 = vmatpush.msrb.mxu0 %v1676_v21  ;;  %694 = vmatpush.msra.mxu2 %v1682_v23 }
 0x157   :  { %717 = vmatpush.msra.mxu3 %v1720_v36  ;;  %757 = vmatpush.msrb.mxu1 %v1726_v38  ;;  %v832_v36 = vld [vmem:[#allocation10 + $0xe0] sm:$0xff]  ;;  %v833_v38 = vld [vmem:[#allocation10 + $0xe8] sm:$0xff] }
 0x158   :  { %734 = vmatpush.msrb.mxu0 %v1688_v25  ;;  %695 = vmatpush.msra.mxu2 %v1694_v27  ;;  %v867_v27 = vld [vmem:[#allocation10 + $0x1f8] sm:$0xff] }
 0x159   :  { %718 = vmatpush.msra.mxu3 %v1732_v40  ;;  %758 = vmatpush.msrb.mxu1 %v1738_v42  ;;  %v830_v40 = vld [vmem:[#allocation10 + $0xd0] sm:$0xff]  ;;  %v831_v42 = vld [vmem:[#allocation10 + $0xd8] sm:$0xff] }
 0x15a   :  { %735 = vmatpush.msrb.mxu0 %v1700_v29  ;;  %696 = vmatpush.msra.mxu2 %v1706_v31  ;;  %v865_v29 = vld [vmem:[#allocation10 + $0x1e8] sm:$0xff]  ;;  %v863_v31 = vld [vmem:[#allocation10 + $0x1d8] sm:$0xff] }
 0x15b   :  { %719 = vmatpush.msra.mxu3 %v1744_v44  ;;  %759 = vmatpush.msrb.mxu1 %v1750_v46  ;;  %v828_v44 = vld [vmem:[#allocation10 + $0xc0] sm:$0xff]  ;;  %v829_v46 = vld [vmem:[#allocation10 + $0xc8] sm:$0xff] }
 0x15c   :  { %736 = vmatpush.msrb.mxu0 %v1712_v33  ;;  %697 = vmatpush.msra.mxu2 %v1718_v35  ;;  %v860_v33 = vld [vmem:[#allocation10 + $0x1c0] sm:$0xff]  ;;  %v861_v35 = vld [vmem:[#allocation10 + $0x1c8] sm:$0xff] }
 0x15d   :  { %720 = vmatpush.msra.mxu3 %v1756_v48  ;;  %760 = vmatpush.msrb.mxu1 %v1762_v50  ;;  %v826_v48 = vld [vmem:[#allocation10 + $0xb0] sm:$0xff]  ;;  %v852_v50 = vld [vmem:[#allocation10 + $0x180] sm:$0xff] }
 0x15e   :  { %737 = vmatpush.msrb.mxu0 %v1724_v37  ;;  %698 = vmatpush.msra.mxu2 %v1730_v39  ;;  %v858_v37 = vld [vmem:[#allocation10 + $0x1b0] sm:$0xff]  ;;  %v859_v39 = vld [vmem:[#allocation10 + $0x1b8] sm:$0xff] }
 0x15f   :  { %721 = vmatpush.msra.mxu3 %v1768_v52  ;;  %761 = vmatpush.msrb.mxu1 %v1774_v54  ;;  %v827_v52 = vld [vmem:[#allocation10 + $0xb8] sm:$0xff]  ;;  %v853_v54 = vld [vmem:[#allocation10 + $0x188] sm:$0xff] }
 0x160   :  { %738 = vmatpush.msrb.mxu0 %v1736_v41  ;;  %699 = vmatpush.msra.mxu2 %v1742_v43  ;;  %v856_v41 = vld [vmem:[#allocation10 + $0x1a0] sm:$0xff]  ;;  %v857_v43 = vld [vmem:[#allocation10 + $0x1a8] sm:$0xff] }
 0x161   :  { %722 = vmatpush.msra.mxu3 %v1780_v56  ;;  %762 = vmatpush.msrb.mxu1 %v2464_v6  ;;  %v824_v56 = vld [vmem:[#allocation10 + $0xa0] sm:$0xff]  ;;  %v843_v6 = vld [vmem:[#allocation10 + $0x138] sm:$0xff] }
 0x162   :  { %739 = vmatpush.msrb.mxu0 %v1748_v45  ;;  %700 = vmatpush.msra.mxu2 %v1752_v47  ;;  %v854_v45 = vld [vmem:[#allocation10 + $0x190] sm:$0xff]  ;;  %v855_v47 = vld [vmem:[#allocation10 + $0x198] sm:$0xff] }
 0x163   :  { %723 = vmatpush.msra.mxu3 %v2446_v0  ;;  %763 = vmatpush.msrb.mxu1 %v2465_v9  ;;  %v825_v0 = vld [vmem:[#allocation10 + $0xa8] sm:$0xff]  ;;  %v814_v9 = vld [vmem:[#allocation10 + $0x50] sm:$0xff] }
 0x164   :  { %740 = vmatpush.msrb.mxu0 %v2447_v5  ;;  %701 = vmatpush.msra.mxu2 %v2466_v11  ;;  %v851_v5 = vld [vmem:[#allocation10 + $0x178] sm:$0xff]  ;;  %v840_v11 = vld [vmem:[#allocation10 + $0x120] sm:$0xff] }
 0x165   :  { %724 = vmatpush.msra.mxu3 %v2467_v12  ;;  %764 = vmatpush.msrb.mxu1 %v2452_v62  ;;  %v820_v62 = vld [vmem:[#allocation10 + $0x80] sm:$0xff]  ;;  %v815_v12 = vld [vmem:[#allocation10 + $0x58] sm:$0xff] }
 0x166   :  { %741 = vmatpush.msrb.mxu0 %v2451_v58  ;;  %702 = vmatpush.msra.mxu2 %v2454_v4  ;;  %v850_v58 = vld [vmem:[#allocation10 + $0x170] sm:$0xff]  ;;  %v847_v4 = vld [vmem:[#allocation10 + $0x158] sm:$0xff] }
 0x167   :  { %725 = vmatpush.msra.mxu3 %v2455_v3  ;;  %765 = vmatpush.msrb.mxu1 %v2457_v51  ;;  %v818_v51 = vld [vmem:[#allocation10 + $0x70] sm:$0xff] }
 0x168   :  { %742 = vmatpush.msrb.mxu0 %v2456_v49  ;;  %703 = vmatpush.msra.mxu2 %v2458_v57  ;;  %v848_v49 = vld [vmem:[#allocation10 + $0x160] sm:$0xff]  ;;  %v819_v57 = vld [vmem:[#allocation10 + $0x78] sm:$0xff] }
 0x16a   :  { %743 = vmatpush.msrb.mxu0 %v2459_v2  ;;  %704 = vmatpush.msra.mxu2 %v2460_v60  ;;  %v845_v2 = vld [vmem:[#allocation10 + $0x148] sm:$0xff] }
 0x16c   :  { %744 = vmatpush.msrb.mxu0 %v2461_v55  ;;  %705 = vmatpush.msra.mxu2 %v2462_v7  ;;  %v816_v55 = vld [vmem:[#allocation10 + $0x60] sm:$0xff]  ;;  %v842_v7 = vld [vmem:[#allocation10 + $0x130] sm:$0xff] }
 0x16e   :  { %745 = vmatpush.msrb.mxu0 %v2463_v10  ;;  %v817_v10 = vld [vmem:[#allocation10 + $0x68] sm:$0xff] }
 0x1c4   :  { %v605_v17 = vpop.f32.mrf.mxu1 }
 0x1ca   :  { %v585_v15 = vpop.f32.mrf.mxu0  ;;  %v565_v22 = vpop.f32.mrf.mxu3 }
 0x1cb   :  { %v586_v16 = vadd.f32 %v585_v15, %v525_v14  ;;  %v812_v15 = vld [vmem:[#allocation10 + $0x40] sm:$0xff] }
 0x1cd   :  { %v2052_v18 = vadd.f32 %v605_v17, %v586_v16  ;;  %v838_v16 = vld [vmem:[#allocation10 + $0x110] sm:$0xff]  ;;  %v813_v17 = vld [vmem:[#allocation10 + $0x48] sm:$0xff] }
 0x1cf   :  { %644 = vmatmul.f32.vlgmr.msrb.gmra.mxu3 %v2052_v18  ;;  %684 = vmatmul.f32.vlgmr.msra.gmra.mxu1 %v2052_v18  ;;  %v689_v24 = vmul.f32 %v2052_v18, %v2052_v18 }
 0x1d0   :  { %v545_v20 = vpop.f32.mrf.mxu2  ;;  %894 = vmatpush.msrb.mxu3 %v866_v26  ;;  %934 = vmatpush.msra.mxu1 %v867_v27  ;;  %v837_v26 = vld [vmem:[#allocation10 + $0x108] sm:$0xff]  ;;  %v808_v27 = vld [vmem:[#allocation10 + $0x20] sm:$0xff] }
 0x1d1   :  { %v546_v21 = vadd.f32 %v545_v20, %v524_v19  ;;  %v839_v20 = vld [vmem:[#allocation10 + $0x118] sm:$0xff] }
 0x1d2   :  { %895 = vmatpush.msrb.mxu3 %v864_v28  ;;  %935 = vmatpush.msra.mxu1 %v865_v29  ;;  %v809_v28 = vld [vmem:[#allocation10 + $0x28] sm:$0xff] }
 0x1d3   :  { %v2056_v23 = vadd.f32 %v565_v22, %v546_v21  ;;  %v810_v22 = vld [vmem:[#allocation10 + $0x30] sm:$0xff] }
 0x1d4   :  { %896 = vmatpush.msrb.mxu3 %v862_v30  ;;  %936 = vmatpush.msra.mxu1 %v863_v31  ;;  %v806_v31 = vld [vmem:[#allocation10 + $0x10] sm:$0xff] }
 0x1d5   :  { %624 = vmatmul.f32.vlgmr.msrb.gmra.mxu2 %v2056_v23  ;;  %664 = vmatmul.f32.vlgmr.msra.gmra.mxu0 %v2056_v23  ;;  %v688_v25 = vmul.f32 %v2056_v23, %v2056_v23 }
 0x1d6   :  { %874 = vmatpush.msrb.mxu2 %v834_v32  ;;  %897 = vmatpush.msrb.mxu3 %v860_v33 }
 0x1d7   :  { %726 = vmatmul.f32.vlgmr.msra.gmra.mxu3 %v689_v24  ;;  %766 = vmatmul.f32.vlgmr.msrb.gmra.mxu1 %v689_v24  ;;  %v836_v24 = vld [vmem:[#allocation10 + $0x100] sm:$0xff] }
 0x1d8   :  { %914 = vmatpush.msra.mxu0 %v835_v34  ;;  %937 = vmatpush.msra.mxu1 %v861_v35  ;;  %v807_v34 = vld [vmem:[#allocation10 + $0x18] sm:$0xff]  ;;  %v2068_v35 = vld [vmem:[#allocation5 + $0x1f0] sm:$0xff] }
 0x1d9   :  { %875 = vmatpush.msrb.mxu2 %v832_v36  ;;  %898 = vmatpush.msrb.mxu3 %v858_v37  ;;  %v804_v36 = vld [vmem:[#allocation10] sm:$0xff]  ;;  %v2071_v37 = vld [vmem:[#allocation5 + $0x1f8] sm:$0xff] }
 0x1da   :  { %915 = vmatpush.msra.mxu0 %v833_v38  ;;  %938 = vmatpush.msra.mxu1 %v859_v39 }
 0x1db   :  { %876 = vmatpush.msrb.mxu2 %v830_v40  ;;  %899 = vmatpush.msrb.mxu3 %v856_v41  ;;  %v805_v40 = vld [vmem:[#allocation10 + $0x8] sm:$0xff]  ;;  %v2076_v41 = vld [vmem:[#allocation5 + $0x1e0] sm:$0xff] }
 0x1dc   :  { %916 = vmatpush.msra.mxu0 %v831_v42  ;;  %939 = vmatpush.msra.mxu1 %v857_v43  ;;  %v2079_v42 = vld [vmem:[#allocation5 + $0x1e8] sm:$0xff] }
 0x1dd   :  { %706 = vmatmul.f32.vlgmr.msra.gmra.mxu2 %v688_v25  ;;  %746 = vmatmul.f32.vlgmr.msrb.gmra.mxu0 %v688_v25  ;;  %v811_v25 = vld [vmem:[#allocation10 + $0x38] sm:$0xff] }
 0x1de   :  { %877 = vmatpush.msrb.mxu2 %v828_v44  ;;  %900 = vmatpush.msrb.mxu3 %v854_v45  ;;  %v2082_v44 = vld [vmem:[#allocation5 + $0x1d0] sm:$0xff] }
 0x1df   :  { %917 = vmatpush.msra.mxu0 %v829_v46  ;;  %940 = vmatpush.msra.mxu1 %v855_v47  ;;  %v2085_v47 = vld [vmem:[#allocation5 + $0x1d8] sm:$0xff] }
 0x1e0   :  { %878 = vmatpush.msrb.mxu2 %v826_v48  ;;  %901 = vmatpush.msrb.mxu3 %v852_v50 }
 0x1e1   :  { %918 = vmatpush.msra.mxu0 %v827_v52  ;;  %941 = vmatpush.msra.mxu1 %v853_v54  ;;  %v2092_v54 = vld [vmem:[#allocation5 + $0xf0] sm:$0xff] }
 0x1e2   :  { %879 = vmatpush.msrb.mxu2 %v824_v56  ;;  %902 = vmatpush.msrb.mxu3 %v850_v58  ;;  %v2095_v56 = vld [vmem:[#allocation5 + $0x1c0] sm:$0xff]  ;;  %v2098_v58 = vld [vmem:[#allocation5 + $0xf8] sm:$0xff] }
 0x1e3   :  { %919 = vmatpush.msra.mxu0 %v825_v0  ;;  %942 = vmatpush.msra.mxu1 %v851_v5  ;;  %v2101_v0 = vld [vmem:[#allocation5 + $0x1c8] sm:$0xff] }
 0x1e4   :  { %880 = vmatpush.msrb.mxu2 %v822_v61  ;;  %903 = vmatpush.msrb.mxu3 %v848_v49  ;;  %v2105_v61 = vld [vmem:[#allocation5 + $0xe0] sm:$0xff]  ;;  %v2108_v49 = vld [vmem:[#allocation5 + $0x1b0] sm:$0xff] }
 0x1e5   :  { %920 = vmatpush.msra.mxu0 %v823_v1  ;;  %943 = vmatpush.msra.mxu1 %v849_v63  ;;  %v2111_v1 = vld [vmem:[#allocation5 + $0xe8] sm:$0xff]  ;;  %v2114_v63 = vld [vmem:[#allocation5 + $0x1b8] sm:$0xff] }
 0x1e6   :  { %881 = vmatpush.msrb.mxu2 %v820_v62  ;;  %904 = vmatpush.msrb.mxu3 %v846_v53  ;;  %v2117_v53 = vld [vmem:[#allocation5 + $0xd0] sm:$0xff] }
 0x1e7   :  { %921 = vmatpush.msra.mxu0 %v821_v59  ;;  %944 = vmatpush.msra.mxu1 %v847_v4  ;;  %v2120_v59 = vld [vmem:[#allocation5 + $0x1a0] sm:$0xff]  ;;  %v2123_v4 = vld [vmem:[#allocation5 + $0xd8] sm:$0xff] }
 0x1e8   :  { %882 = vmatpush.msrb.mxu2 %v818_v51  ;;  %905 = vmatpush.msrb.mxu3 %v844_v8  ;;  %v2131_v8 = vld [vmem:[#allocation5 + $0xc0] sm:$0xff] }
 0x1e9   :  { %922 = vmatpush.msra.mxu0 %v819_v57  ;;  %945 = vmatpush.msra.mxu1 %v845_v2  ;;  %v2134_v57 = vld [vmem:[#allocation5 + $0x190] sm:$0xff]  ;;  %v2137_v2 = vld [vmem:[#allocation5 + $0xc8] sm:$0xff] }
 0x1ea   :  { %883 = vmatpush.msrb.mxu2 %v816_v55  ;;  %906 = vmatpush.msrb.mxu3 %v842_v7  ;;  %v2146_v7 = vld [vmem:[#allocation5 + $0xb0] sm:$0xff] }
 0x1eb   :  { %923 = vmatpush.msra.mxu0 %v817_v10  ;;  %946 = vmatpush.msra.mxu1 %v843_v6  ;;  %v2149_v10 = vld [vmem:[#allocation5 + $0x180] sm:$0xff] }
 0x1ec   :  { %884 = vmatpush.msrb.mxu2 %v814_v9  ;;  %907 = vmatpush.msrb.mxu3 %v840_v11  ;;  %v2154_v9 = vld [vmem:[#allocation5 + $0xb8] sm:$0xff]  ;;  %v2157_v11 = vld [vmem:[#allocation5 + $0x188] sm:$0xff] }
 0x1ed   :  { %924 = vmatpush.msra.mxu0 %v815_v12  ;;  %947 = vmatpush.msra.mxu1 %v841_v13  ;;  %v2160_v12 = vld [vmem:[#allocation5 + $0xa0] sm:$0xff]  ;;  %v2163_v13 = vld [vmem:[#allocation5 + $0x170] sm:$0xff] }
 0x1ee   :  { %885 = vmatpush.msrb.mxu2 %v812_v15  ;;  %908 = vmatpush.msrb.mxu3 %v838_v16  ;;  %v2167_v15 = vld [vmem:[#allocation5 + $0xa8] sm:$0xff]  ;;  %v2170_v16 = vld [vmem:[#allocation5 + $0x178] sm:$0xff] }
 0x1ef   :  { %925 = vmatpush.msra.mxu0 %v813_v17  ;;  %948 = vmatpush.msra.mxu1 %v839_v20  ;;  %v2173_v17 = vld [vmem:[#allocation5 + $0x90] sm:$0xff]  ;;  %v2176_v20 = vld [vmem:[#allocation5 + $0x160] sm:$0xff] }
 0x1f0   :  { %886 = vmatpush.msrb.mxu2 %v810_v22  ;;  %909 = vmatpush.msrb.mxu3 %v836_v24  ;;  %v2179_v22 = vld [vmem:[#allocation5 + $0x98] sm:$0xff]  ;;  %v2182_v24 = vld [vmem:[#allocation5 + $0x168] sm:$0xff] }
 0x1f1   :  { %926 = vmatpush.msra.mxu0 %v811_v25  ;;  %949 = vmatpush.msra.mxu1 %v837_v26  ;;  %v2187_v26 = vld [vmem:[#allocation5 + $0x80] sm:$0xff] }
 0x1f2   :  { %887 = vmatpush.msrb.mxu2 %v808_v27  ;;  %974 = vmatpush.msra.mxu3 %v2068_v35  ;;  %v2190_v27 = vld [vmem:[#allocation5 + $0x150] sm:$0xff] }
 0x1f3   :  { %927 = vmatpush.msra.mxu0 %v809_v28  ;;  %1014 = vmatpush.msrb.mxu1 %v2071_v37 }
 0x1f4   :  { %888 = vmatpush.msrb.mxu2 %v806_v31  ;;  %975 = vmatpush.msra.mxu3 %v2076_v41  ;;  %v2199_v31 = vld [vmem:[#allocation5 + $0x158] sm:$0xff] }
 0x1f5   :  { %928 = vmatpush.msra.mxu0 %v807_v34  ;;  %1015 = vmatpush.msrb.mxu1 %v2079_v42 }
 0x1f6   :  { %889 = vmatpush.msrb.mxu2 %v804_v36  ;;  %976 = vmatpush.msra.mxu3 %v2082_v44 }
 0x1f7   :  { %929 = vmatpush.msra.mxu0 %v805_v40  ;;  %1016 = vmatpush.msrb.mxu1 %v2085_v47  ;;  %v2214_v40 = vld [vmem:[#allocation5 + $0x148] sm:$0xff] }
 0x1f8   :  { %954 = vmatpush.msra.mxu2 %v2092_v54  ;;  %977 = vmatpush.msra.mxu3 %v2095_v56 }
 0x1f9   :  { %994 = vmatpush.msrb.mxu0 %v2098_v58  ;;  %1017 = vmatpush.msrb.mxu1 %v2101_v0 }
 0x1fa   :  { %955 = vmatpush.msra.mxu2 %v2105_v61  ;;  %978 = vmatpush.msra.mxu3 %v2108_v49 }
 0x1fb   :  { %995 = vmatpush.msrb.mxu0 %v2111_v1  ;;  %1018 = vmatpush.msrb.mxu1 %v2114_v63 }
 0x1fc   :  { %956 = vmatpush.msra.mxu2 %v2117_v53  ;;  %979 = vmatpush.msra.mxu3 %v2120_v59 }
 0x1fd   :  { %996 = vmatpush.msrb.mxu0 %v2123_v4 }
 0x1fe   :  { %957 = vmatpush.msra.mxu2 %v2131_v8  ;;  %980 = vmatpush.msra.mxu3 %v2134_v57 }
 0x1ff   :  { %997 = vmatpush.msrb.mxu0 %v2137_v2 }
 0x200   :  { %958 = vmatpush.msra.mxu2 %v2146_v7  ;;  %981 = vmatpush.msra.mxu3 %v2149_v10 }
 0x201   :  { %998 = vmatpush.msrb.mxu0 %v2154_v9 }
 0x202   :  { %959 = vmatpush.msra.mxu2 %v2160_v12  ;;  %982 = vmatpush.msra.mxu3 %v2163_v13 }
 0x203   :  { %999 = vmatpush.msrb.mxu0 %v2167_v15 }
 0x204   :  { %960 = vmatpush.msra.mxu2 %v2173_v17  ;;  %983 = vmatpush.msra.mxu3 %v2176_v20 }
 0x205   :  { %1000 = vmatpush.msrb.mxu0 %v2179_v22 }
 0x206   :  { %961 = vmatpush.msra.mxu2 %v2187_v26  ;;  %984 = vmatpush.msra.mxu3 %v2190_v27 }
 0x24c   :  { %v685_v3 = vpop.f32.mrf.mxu1 }
 0x252   :  { %v665_v60 = vpop.f32.mrf.mxu0  ;;  %v645_v14 = vpop.f32.mrf.mxu3 }
 0x253   :  { %v2064_v19 = vadd.f32 %v685_v3, %v665_v60  ;;  %v2126_v3 = vld [vmem:[#allocation5 + $0x1a8] sm:$0xff]  ;;  %v2140_v60 = vld [vmem:[#allocation5 + $0x198] sm:$0xff] }
 0x254   :  { %v767_v29 = vpop.f32.mrf.mxu1  ;;  %1019 = vmatpush.msrb.mxu1 %v2126_v3 }
 0x255   :  { %v771_v32 = vmul.f32 %v2064_v19, %v2064_v19 }
 0x256   :  { %1020 = vmatpush.msrb.mxu1 %v2140_v60 }
 0x258   :  { %v625_v21 = vpop.f32.mrf.mxu2  ;;  %1021 = vmatpush.msrb.mxu1 %v2157_v11 }
 0x259   :  { %v2074_v38 = vadd.f32 %v645_v14, %v625_v21 }
 0x25a   :  { %v747_v30 = vpop.f32.mrf.mxu0  ;;  %v727_v45 = vpop.f32.mrf.mxu3  ;;  %1022 = vmatpush.msrb.mxu1 %v2170_v16 }
 0x25b   :  { %v768_v33 = vadd.f32 %v767_v29, %v747_v30  ;;  %v770_v48 = vmul.f32 %v2074_v38, %v2074_v38  ;;  %v2196_v30 = vld [vmem:[#allocation5 + $0x88] sm:$0xff] }
 0x25c   :  { %1023 = vmatpush.msrb.mxu1 %v2182_v24  ;;  %1001 = vmatpush.msrb.mxu0 %v2196_v30 }
 0x25d   :  { %v773_v39 = vsub.f32 %v768_v33, %v771_v32  ;;  %v2202_v32 = vld [vmem:[#allocation5 + $0x70] sm:$0xff]  ;;  %v2205_v33 = vld [vmem:[#allocation5 + $0x140] sm:$0xff] }
 0x25e   :  { %1024 = vmatpush.msrb.mxu1 %v2199_v31  ;;  %962 = vmatpush.msra.mxu2 %v2202_v32 }
 0x25f   :  { %v775_v43 = vmax.f32 %v773_v39, 0.0  ;;  %985 = vmatpush.msra.mxu3 %v2205_v33  ;;  %v2211_v39 = vld [vmem:[#allocation5 + $0x78] sm:$0xff] }
 0x260   :  { %v707_v46 = vpop.f32.mrf.mxu2  ;;  %1002 = vmatpush.msrb.mxu0 %v2211_v39  ;;  %1025 = vmatpush.msrb.mxu1 %v2214_v40 }
 0x261   :  { %v2090_v50 = vadd.f32 1e-05, %v775_v43  ;;  %v728_v52 = vadd.f32 %v727_v45, %v707_v46  ;;  %v777_v43 = vsub.f32 %v2052_v18, %v2064_v19  ;;  %v2221_v45 = vld [vmem:[#allocation5 + $0x60] sm:$0xff]  ;;  %v2224_v46 = vld [vmem:[#allocation5 + $0x130] sm:$0xff] }
 0x262   :  { %963 = vmatpush.msra.mxu2 %v2221_v45  ;;  %986 = vmatpush.msra.mxu3 %v2224_v46  ;;  %v2234_v19 = vld [vmem:[#allocation5 + $0x50] sm:$0xff] }
 0x263   :  { %1280 = vrsqrt.f32 %v2090_v50  ;;  %v772_v5 = vsub.f32 %v728_v52, %v770_v48  ;;  %vm796_vm9 = vweird.f32 %v2090_v50  ;;  %v2228_v52 = vld [vmem:[#allocation5 + $0x68] sm:$0xff] }
 0x264   :  { %1003 = vmatpush.msrb.mxu0 %v2228_v52  ;;  %964 = vmatpush.msra.mxu2 %v2234_v19 }
 0x265   :  { %v774_v62 = vmax.f32 %v772_v5, 0.0  ;;  %v2231_v5 = vld [vmem:[#allocation5 + $0x138] sm:$0xff] }
 0x266   :  { %1026 = vmatpush.msrb.mxu1 %v2231_v5 }
 0x267   :  { %v2129_v51 = vadd.f32 1e-05, %v774_v62  ;;  %v2237_v62 = vld [vmem:[#allocation5 + $0x120] sm:$0xff] }
 0x268   :  { %987 = vmatpush.msra.mxu3 %v2237_v62 }
 0x269   :  { %v2143_v55 = vpop.eup %1280  ;;  %1282 = vrsqrt.f32 %v2129_v51  ;;  %vm786_vm12 = vweird.f32 %v2129_v51 }
 0x26a   :  { %v791_v6 = vmul.f32 %v2143_v55, %v2090_v50  ;;  %vm797_vm8 = vweird.f32 %v2143_v55 }
 0x26b   :  { %vm798_vm10 = vmor %vm796_vm9, %vm797_vm8 }
 0x26c   :  { %v792_v14 = vmul.f32 %v2143_v55, %v791_v6 }
 0x26e   :  { %v793_v21 = vmul.f32 0.5, %v792_v14  ;;  %v2244_v14 = vld [vmem:[#allocation5 + $0x128] sm:$0xff] }
 0x26f   :  { %v2185_v25 = vpop.eup %1282  ;;  %1027 = vmatpush.msrb.mxu1 %v2244_v14 }
 0x270   :  { %v794_v28 = vsub.f32 1.5, %v793_v21  ;;  %v781_v29 = vmul.f32 %v2185_v25, %v2129_v51  ;;  %vm787_vm11 = vweird.f32 %v2185_v25  ;;  %v2269_v51 = vld [vmem:[#allocation5 + $0x100] sm:$0xff] }
 0x271   :  { %vm788_vm13 = vmor %vm786_vm12, %vm787_vm11 }
 0x272   :  { %v795_v34 = vmul.f32 %v2143_v55, %v794_v28  ;;  %v782_v36 = vmul.f32 %v2185_v25, %v781_v29  ;;  %v2247_v28 = vld [vmem:[#allocation5 + $0x40] sm:$0xff]  ;;  %v2250_v29 = vld [vmem:[#allocation5 + $0x110] sm:$0xff] }
 0x273   :  { %965 = vmatpush.msra.mxu2 %v2247_v28  ;;  %988 = vmatpush.msra.mxu3 %v2250_v29 }
 0x274   :  { %v783_v48 = vmul.f32 0.5, %v782_v36  ;;  %v799_v50 = vsel %vm798_vm10, %v2143_v55, %v795_v34  ;;  %v2241_v55 = vld [vmem:[#allocation5 + $0x58] sm:$0xff]  ;;  %v2255_v36 = vld [vmem:[#allocation5 + $0x48] sm:$0xff] }
 0x275   :  { %v801_v18 = vmul.f32 %v799_v50, %v777_v43  ;;  %1004 = vmatpush.msrb.mxu0 %v2241_v55  ;;  %v2258_v43 = vld [vmem:[#allocation5 + $0x118] sm:$0xff]  ;;  %989 = vmatpush.msra.mxu3 %v2269_v51 }
 0x276   :  { %v784_v6 = vsub.f32 1.5, %v783_v48  ;;  %2468 = vst [vmem:[#allocation26_spill] sm:$0xff] %v2258_v43  ;;  %1028 = vmatpush.msrb.mxu1 %v2258_v43  ;;  %v776_v48 = vsub.f32 %v2056_v23, %v2074_v38  ;;  %v2272_v43 = vld [vmem:[#allocation5 + $0x38] sm:$0xff]  ;;  %v2275_v23 = vld [vmem:[#allocation5 + $0x108] sm:$0xff] }
 0x277   :  { %v803_v21 = vmax.f32 %v801_v18, 0.0  ;;  %1005 = vmatpush.msrb.mxu0 %v2255_v36  ;;  %v2266_v18 = vld [vmem:[#allocation5 + $0x30] sm:$0xff] }
 0x278   :  { %v785_v34 = vmul.f32 %v2185_v25, %v784_v6  ;;  %966 = vmatpush.msra.mxu2 %v2266_v18  ;;  %1029 = vmatpush.msrb.mxu1 %v2275_v23 }
 0x279   :  { %910 = vmatmul.f32.vlgmr.msrb.gmra.mxu3 %v803_v21  ;;  %950 = vmatmul.f32.vlgmr.msra.gmra.mxu1 %v803_v21  ;;  %v2283_v21 = vld [vmem:[#allocation5 + $0x28] sm:$0xff] }
 0x27a   :  { %v789_v50 = vsel %vm788_vm13, %v2185_v25, %v785_v34  ;;  %1006 = vmatpush.msrb.mxu0 %v2272_v43  ;;  %1056 = vmatpush.msrb.mxu3 %v2068_v35  ;;  %v2280_v25 = vld [vmem:[#allocation5 + $0x20] sm:$0xff]  ;;  %v2288_v34 = vld [vmem:[#allocation5 + $0x10] sm:$0xff]  ;;  %v1351_v35 = vld [vmem:[#allocation5 + $0x18] sm:$0xff] }
 0x27b   :  { %v800_v6 = vmul.f32 %v789_v50, %v776_v48  ;;  %1096 = vmatpush.msra.mxu1 %v2071_v37  ;;  %967 = vmatpush.msra.mxu2 %v2280_v25  ;;  %v1352_v37 = vld [vmem:[#allocation5] sm:$0xff]  ;;  %v1353_v48 = vld [vmem:[#allocation5 + $0x8] sm:$0xff] }
 0x27c   :  { %1007 = vmatpush.msrb.mxu0 %v2283_v21  ;;  %1057 = vmatpush.msrb.mxu3 %v2076_v41 }
 0x27d   :  { %v802_v38 = vmax.f32 %v800_v6, 0.0  ;;  %1097 = vmatpush.msra.mxu1 %v2079_v42  ;;  %968 = vmatpush.msra.mxu2 %v2288_v34  ;;  %v2469_v41 = vld [vmem:[#allocation26_spill] sm:$0xff]  ;;  %v868_v42 = vld [vmem:[%s2384_s7] sm:$0x3] }
 0x27e   :  { %1008 = vmatpush.msrb.mxu0 %v1351_v35  ;;  %1058 = vmatpush.msrb.mxu3 %v2082_v44  ;;  %v871_v44 = vperm.slane %v868_v42, 1 }
 0x27f   :  { %890 = vmatmul.f32.vlgmr.msrb.gmra.mxu2 %v802_v38  ;;  %930 = vmatmul.f32.vlgmr.msra.gmra.mxu0 %v802_v38 }
 0x280   :  { %1098 = vmatpush.msra.mxu1 %v2085_v47  ;;  %969 = vmatpush.msra.mxu2 %v1352_v37 }
 0x281   :  { %1009 = vmatpush.msrb.mxu0 %v1353_v48  ;;  %1059 = vmatpush.msrb.mxu3 %v2095_v56 }
 0x282   :  { %1036 = vmatpush.msrb.mxu2 %v2092_v54  ;;  %1099 = vmatpush.msra.mxu1 %v2101_v0  ;;  %v870_v0 = vperm.slane %v868_v42, 0 }
 0x283   :  { %1076 = vmatpush.msra.mxu0 %v2098_v58  ;;  %1060 = vmatpush.msrb.mxu3 %v2108_v49 }
 0x284   :  { %1037 = vmatpush.msrb.mxu2 %v2105_v61  ;;  %1100 = vmatpush.msra.mxu1 %v2114_v63 }
 0x285   :  { %1077 = vmatpush.msra.mxu0 %v2111_v1  ;;  %1061 = vmatpush.msrb.mxu3 %v2120_v59 }
 0x286   :  { %1038 = vmatpush.msrb.mxu2 %v2117_v53  ;;  %1101 = vmatpush.msra.mxu1 %v2126_v3  ;;  %v1180_v3 = vld [vmem:[#allocation11 + $0xf0] sm:$0xff] }
 0x287   :  { %1078 = vmatpush.msra.mxu0 %v2123_v4  ;;  %1062 = vmatpush.msrb.mxu3 %v2134_v57  ;;  %v1181_v4 = vld [vmem:[#allocation11 + $0xf8] sm:$0xff] }
 0x288   :  { %1039 = vmatpush.msrb.mxu2 %v2131_v8  ;;  %1102 = vmatpush.msra.mxu1 %v2140_v60  ;;  %v1179_v8 = vld [vmem:[#allocation11 + $0xe8] sm:$0xff]  ;;  %v1165_v57 = vld [vmem:[#allocation11 + $0x78] sm:$0xff]  ;;  %v1164_v60 = vld [vmem:[#allocation11 + $0x70] sm:$0xff] }
 0x289   :  { %1079 = vmatpush.msra.mxu0 %v2137_v2  ;;  %1063 = vmatpush.msrb.mxu3 %v2149_v10  ;;  %v1178_v2 = vld [vmem:[#allocation11 + $0xe0] sm:$0xff]  ;;  %v1163_v10 = vld [vmem:[#allocation11 + $0x68] sm:$0xff] }
 0x28a   :  { %1040 = vmatpush.msrb.mxu2 %v2146_v7  ;;  %1103 = vmatpush.msra.mxu1 %v2157_v11  ;;  %v1177_v7 = vld [vmem:[#allocation11 + $0xd8] sm:$0xff]  ;;  %v1162_v11 = vld [vmem:[#allocation11 + $0x60] sm:$0xff] }
 0x28b   :  { %1080 = vmatpush.msra.mxu0 %v2154_v9  ;;  %1064 = vmatpush.msrb.mxu3 %v2163_v13  ;;  %v1176_v9 = vld [vmem:[#allocation11 + $0xd0] sm:$0xff]  ;;  %v1161_v13 = vld [vmem:[#allocation11 + $0x58] sm:$0xff] }
 0x28c   :  { %1041 = vmatpush.msrb.mxu2 %v2160_v12  ;;  %1104 = vmatpush.msra.mxu1 %v2170_v16  ;;  %v1175_v12 = vld [vmem:[#allocation11 + $0xc8] sm:$0xff]  ;;  %v1160_v16 = vld [vmem:[#allocation11 + $0x50] sm:$0xff] }
 0x28d   :  { %1081 = vmatpush.msra.mxu0 %v2167_v15  ;;  %1065 = vmatpush.msrb.mxu3 %v2176_v20  ;;  %v1174_v15 = vld [vmem:[#allocation11 + $0xc0] sm:$0xff]  ;;  %v1159_v20 = vld [vmem:[#allocation11 + $0x48] sm:$0xff] }
 0x28e   :  { %1042 = vmatpush.msrb.mxu2 %v2173_v17  ;;  %1105 = vmatpush.msra.mxu1 %v2182_v24  ;;  %v1173_v17 = vld [vmem:[#allocation11 + $0xb8] sm:$0xff]  ;;  %v1158_v24 = vld [vmem:[#allocation11 + $0x40] sm:$0xff] }
 0x28f   :  { %1082 = vmatpush.msra.mxu0 %v2179_v22  ;;  %1066 = vmatpush.msrb.mxu3 %v2190_v27  ;;  %v1172_v22 = vld [vmem:[#allocation11 + $0xb0] sm:$0xff] }
 0x290   :  { %1043 = vmatpush.msrb.mxu2 %v2187_v26  ;;  %1106 = vmatpush.msra.mxu1 %v2199_v31  ;;  %v1171_v26 = vld [vmem:[#allocation11 + $0xa8] sm:$0xff]  ;;  %v1170_v31 = vld [vmem:[#allocation11 + $0xa0] sm:$0xff] }
 0x291   :  { %1083 = vmatpush.msra.mxu0 %v2196_v30  ;;  %1067 = vmatpush.msrb.mxu3 %v2205_v33  ;;  %v1157_v30 = vld [vmem:[#allocation11 + $0x38] sm:$0xff]  ;;  %v1156_v33 = vld [vmem:[#allocation11 + $0x30] sm:$0xff] }
 0x292   :  { %1044 = vmatpush.msrb.mxu2 %v2202_v32  ;;  %1107 = vmatpush.msra.mxu1 %v2214_v40  ;;  %v1155_v40 = vld [vmem:[#allocation11 + $0x28] sm:$0xff] }
 0x293   :  { %1084 = vmatpush.msra.mxu0 %v2211_v39  ;;  %1068 = vmatpush.msrb.mxu3 %v2224_v46  ;;  %v1169_v39 = vld [vmem:[#allocation11 + $0x98] sm:$0xff] }
 0x294   :  { %1045 = vmatpush.msrb.mxu2 %v2221_v45  ;;  %1108 = vmatpush.msra.mxu1 %v2231_v5  ;;  %v1168_v45 = vld [vmem:[#allocation11 + $0x90] sm:$0xff]  ;;  %v1167_v5 = vld [vmem:[#allocation11 + $0x88] sm:$0xff] }
 0x295   :  { %1085 = vmatpush.msra.mxu0 %v2228_v52  ;;  %1069 = vmatpush.msrb.mxu3 %v2237_v62  ;;  %v1154_v52 = vld [vmem:[#allocation11 + $0x20] sm:$0xff] }
 0x296   :  { %1046 = vmatpush.msrb.mxu2 %v2234_v19  ;;  %1109 = vmatpush.msra.mxu1 %v2244_v14  ;;  %v1166_v14 = vld [vmem:[#allocation11 + $0x80] sm:$0xff] }
 0x297   :  { %1086 = vmatpush.msra.mxu0 %v2241_v55  ;;  %1070 = vmatpush.msrb.mxu3 %v2250_v29  ;;  %v1153_v55 = vld [vmem:[#allocation11 + $0x18] sm:$0xff] }
 0x298   :  { %1047 = vmatpush.msrb.mxu2 %v2247_v28  ;;  %1110 = vmatpush.msra.mxu1 %v2469_v41  ;;  %v1152_v28 = vld [vmem:[#allocation11 + $0x10] sm:$0xff] }
 0x299   :  { %1087 = vmatpush.msra.mxu0 %v2255_v36  ;;  %1071 = vmatpush.msrb.mxu3 %v2269_v51  ;;  %v1150_v51 = vld [vmem:[#allocation11] sm:$0xff] }
 0x29a   :  { %1048 = vmatpush.msrb.mxu2 %v2266_v18  ;;  %1111 = vmatpush.msra.mxu1 %v2275_v23 }
 0x29b   :  { %1088 = vmatpush.msra.mxu0 %v2272_v43  ;;  %v1151_v43 = vld [vmem:[#allocation11 + $0x8] sm:$0xff] }
 0x29c   :  { %1049 = vmatpush.msrb.mxu2 %v2280_v25 }
 0x29d   :  { %1089 = vmatpush.msra.mxu0 %v2283_v21 }
 0x29e   :  { %1050 = vmatpush.msrb.mxu2 %v2288_v34 }
 0x29f   :  { %1090 = vmatpush.msra.mxu0 %v1351_v35 }
 0x2a0   :  { %1051 = vmatpush.msrb.mxu2 %v1352_v37 }
 0x2a1   :  { %1091 = vmatpush.msra.mxu0 %v1353_v48 }
 0x2f6   :  { %v951_v56 = vpop.f32.mrf.mxu1 }
 0x2fc   :  { %v931_v47 = vpop.f32.mrf.mxu0  ;;  %v911_v1 = vpop.f32.mrf.mxu3 }
 0x2fd   :  { %v932_v54 = vadd.f32 %v931_v47, %v871_v44 }
 0x2ff   :  { %v2351_v58 = vadd.f32 %v951_v56, %v932_v54 }
 0x301   :  { %990 = vmatmul.f32.vlgmr.msra.gmra.mxu3 %v2351_v58  ;;  %1030 = vmatmul.f32.vlgmr.msrb.gmra.mxu1 %v2351_v58  ;;  %v1035_v53 = vmul.f32 %v2351_v58, %v2351_v58 }
 0x302   :  { %v891_v61 = vpop.f32.mrf.mxu2  ;;  %1206 = vmatpush.msra.mxu3 %v1181_v4 }
 0x303   :  { %v892_v49 = vadd.f32 %v891_v61, %v870_v0 }
 0x304   :  { %1207 = vmatpush.msra.mxu3 %v1180_v3 }
 0x305   :  { %v2355_v63 = vadd.f32 %v911_v1, %v892_v49 }
 0x306   :  { %1208 = vmatpush.msra.mxu3 %v1179_v8 }
 0x307   :  { %970 = vmatmul.f32.vlgmr.msra.gmra.mxu2 %v2355_v63  ;;  %1010 = vmatmul.f32.vlgmr.msrb.gmra.mxu0 %v2355_v63  ;;  %v1034_v59 = vmul.f32 %v2355_v63, %v2355_v63 }
 0x308   :  { %1186 = vmatpush.msra.mxu2 %v1165_v57  ;;  %1209 = vmatpush.msra.mxu3 %v1178_v2 }
 0x309   :  { %1072 = vmatmul.f32.vlgmr.msrb.gmra.mxu3 %v1035_v53  ;;  %1112 = vmatmul.f32.vlgmr.msra.gmra.mxu1 %v1035_v53 }
 0x30a   :  { %1187 = vmatpush.msra.mxu2 %v1164_v60  ;;  %1210 = vmatpush.msra.mxu3 %v1177_v7 }
 0x30c   :  { %1188 = vmatpush.msra.mxu2 %v1163_v10  ;;  %1211 = vmatpush.msra.mxu3 %v1176_v9 }
 0x30e   :  { %1189 = vmatpush.msra.mxu2 %v1162_v11  ;;  %1212 = vmatpush.msra.mxu3 %v1175_v12 }
 0x30f   :  { %1052 = vmatmul.f32.vlgmr.msrb.gmra.mxu2 %v1034_v59  ;;  %1092 = vmatmul.f32.vlgmr.msra.gmra.mxu0 %v1034_v59 }
 0x310   :  { %1190 = vmatpush.msra.mxu2 %v1161_v13  ;;  %1213 = vmatpush.msra.mxu3 %v1174_v15 }
 0x312   :  { %1191 = vmatpush.msra.mxu2 %v1160_v16  ;;  %1214 = vmatpush.msra.mxu3 %v1173_v17  ;;  %v1274_v17 = vld [vmem:[%s2387_s10] ss:$0 sm:$0xff] }
 0x314   :  { %1192 = vmatpush.msra.mxu2 %v1159_v20  ;;  %1215 = vmatpush.msra.mxu3 %v1172_v22 }
 0x316   :  { %1193 = vmatpush.msra.mxu2 %v1158_v24  ;;  %1216 = vmatpush.msra.mxu3 %v1171_v26 }
 0x318   :  { %1194 = vmatpush.msra.mxu2 %v1157_v30  ;;  %1217 = vmatpush.msra.mxu3 %v1170_v31 }
 0x31a   :  { %1195 = vmatpush.msra.mxu2 %v1156_v33  ;;  %1218 = vmatpush.msra.mxu3 %v1169_v39 }
 0x31c   :  { %1196 = vmatpush.msra.mxu2 %v1155_v40  ;;  %1219 = vmatpush.msra.mxu3 %v1168_v45 }
 0x31e   :  { %1197 = vmatpush.msra.mxu2 %v1154_v52  ;;  %1220 = vmatpush.msra.mxu3 %v1167_v5 }
 0x320   :  { %1198 = vmatpush.msra.mxu2 %v1153_v55  ;;  %1221 = vmatpush.msra.mxu3 %v1166_v14 }
 0x322   :  { %1199 = vmatpush.msra.mxu2 %v1152_v28 }
 0x324   :  { %1200 = vmatpush.msra.mxu2 %v1151_v43 }
 0x326   :  { %1201 = vmatpush.msra.mxu2 %v1150_v51 }
 0x37e   :  { %v1031_v27 = vpop.f32.mrf.mxu1 }
 0x384   :  { %v1011_v32 = vpop.f32.mrf.mxu0  ;;  %v991_v46 = vpop.f32.mrf.mxu3 }
 0x385   :  { %v1032_v19 = vadd.f32 %v1031_v27, %v1011_v32 }
 0x386   :  { %v1113_v29 = vpop.f32.mrf.mxu1 }
 0x387   :  { %v1117_v50 = vmul.f32 %v1032_v19, %v1032_v19  ;;  %v1123_v59 = vsub.f32 %v2351_v58, %v1032_v19  ;;  %v1273_v58 = vld [vmem:[%s2386_s9] ss:$0 sm:$0xff]  ;;  %s1245_s9 = sshll.u32 %s2389_s12, 4  ;;  %s1246_s9 = int_to_ptr.hbm [resolvable:$true] %s1245_s9 }
 0x38a   :  { %v971_v62 = vpop.f32.mrf.mxu2 }
 0x38b   :  { %v992_v6 = vadd.f32 %v991_v46, %v971_v62 }
 0x38c   :  { %v1093_v36 = vpop.f32.mrf.mxu0  ;;  %v1073_v25 = vpop.f32.mrf.mxu3 }
 0x38d   :  { %v1114_v18 = vadd.f32 %v1113_v29, %v1093_v36  ;;  %v1116_v34 = vmul.f32 %v992_v6, %v992_v6  ;;  %v1122_v7 = vsub.f32 %v2355_v63, %v992_v6  ;;  %v1275_v63 = vld [vmem:[%s2388_s11] ss:$0 sm:$0xff] }
 0x38f   :  { %v1119_v23 = vsub.f32 %v1114_v18, %v1117_v50 }
 0x391   :  { %v1121_v38 = vmax.f32 %v1119_v23, 0.0 }
 0x392   :  { %v1053_v21 = vpop.f32.mrf.mxu2 }
 0x393   :  { %v1125_v35 = vadd.f32 1e-05, %v1121_v38  ;;  %v1074_v37 = vadd.f32 %v1073_v25, %v1053_v21 }
 0x395   :  { %1284 = vrsqrt.f32 %v1125_v35  ;;  %v1118_v48 = vsub.f32 %v1074_v37, %v1116_v34  ;;  %vm1142_vm15 = vweird.f32 %v1125_v35 }
 0x397   :  { %v1120_v41 = vmax.f32 %v1118_v48, 0.0 }
 0x399   :  { %v1124_v42 = vadd.f32 1e-05, %v1120_v41 }
 0x39b   :  { %v1285_v44 = vpop.eup %1284  ;;  %1286 = vrsqrt.f32 %v1124_v42  ;;  %vm1132_vm2 = vweird.f32 %v1124_v42 }
 0x39c   :  { %v1137_v47 = vmul.f32 %v1285_v44, %v1125_v35  ;;  %vm1143_vm14 = vweird.f32 %v1285_v44 }
 0x39d   :  { %vm1144_vm0 = vmor %vm1142_vm15, %vm1143_vm14 }
 0x39e   :  { %v1138_v54 = vmul.f32 %v1285_v44, %v1137_v47 }
 0x3a0   :  { %v1139_v56 = vmul.f32 0.5, %v1138_v54 }
 0x3a1   :  { %v1287_v0 = vpop.eup %1286 }
 0x3a2   :  { %v1140_v61 = vsub.f32 1.5, %v1139_v56  ;;  %v1127_v49 = vmul.f32 %v1287_v0, %v1124_v42  ;;  %vm1133_vm1 = vweird.f32 %v1287_v0 }
 0x3a3   :  { %vm1134_vm3 = vmor %vm1132_vm2, %vm1133_vm1 }
 0x3a4   :  { %v1141_v1 = vmul.f32 %v1285_v44, %v1140_v61  ;;  %v1128_v53 = vmul.f32 %v1287_v0, %v1127_v49 }
 0x3a6   :  { %v1129_v4 = vmul.f32 0.5, %v1128_v53  ;;  %v1145_v3 = vsel %vm1144_vm0, %v1285_v44, %v1141_v1 }
 0x3a7   :  { %v1147_v8 = vmul.f32 %v1145_v3, %v1123_v59 }
 0x3a8   :  { %v1130_v57 = vsub.f32 1.5, %v1129_v4 }
 0x3a9   :  { %v1149_v2 = vmax.f32 %v1147_v8, 0.0 }
 0x3aa   :  { %v1131_v60 = vmul.f32 %v1287_v0, %v1130_v57 }
 0x3ab   :  { %1222 = vmatmul.f32.vlgmr.msra.gmra.mxu3 %v1149_v2 }
 0x3ac   :  { %v1135_v10 = vsel %vm1134_vm3, %v1287_v0, %v1131_v60 }
 0x3ad   :  { %v1146_v9 = vmul.f32 %v1135_v10, %v1122_v7 }
 0x3af   :  { %v1148_v11 = vmax.f32 %v1146_v9, 0.0 }
 0x3b1   :  { %1202 = vmatmul.f32.vlgmr.msra.gmra.mxu2 %v1148_v11 }
 0x42e   :  { %v1223_v15 = vpop.f32.mrf.mxu3 }
 0x434   :  { %v1203_v12 = vpop.f32.mrf.mxu2 }
 0x435   :  { %v1204_v13 = vadd.f32 %v1273_v58, %v1203_v12 }
 0x437   :  { %v1224_v16 = vadd.f32 %v1223_v15, %v1204_v13 }
 0x439   :  { %1288 = vtanh.f32 %v1224_v16 }
 0x43f   :  { %v1289_v20 = vpop.eup %1288 }
 0x440   :  { %v1231_v22 = vmul.f32 %v1289_v20, %v1274_v17 }
 0x442   :  { %v1236_v24 = vadd.f32 %v1275_v63, %v1231_v22 }
 0x444   :  { %1237 = vst [vmem:[#allocation13] sm:$0xff] %v1236_v24 }
 0x445   :  { %1248 = dma.vmem_to_hbm [thread:$0]  %s1244_s21, 128, %s1246_s9, [#allocation4]  }
 0x446   :  { %1530 = dma.done.wait [#allocation4], 128  }
 0x447   :  { %1531 = vsyncadd [#allocation4], 4294967168 }
 0x448   :  { %1253 = vsyncpa [#allocation3], 1 }
 0x449   :  { %1254 = vsyncpa [#allocation6], 1 }
 0x44a   :  { %1255 = vsyncpa [#allocation9], 1 }
 0x44b   :  { %1256 = vsyncpa [#allocation12], 1 }
 0x44c   :  { %1257 = vsyncpa [#allocation4], 1 }

</bundles_post_ra>
